<compile_context>
chip_gen: v7x
topology: tpu7x:2x2x1
jax: 0.10.0
libtpu: 0.0.40
codegen_flags: <defaults>
</compile_context>

<pallas_src>
import jax
import jax.numpy as jnp
from jax.experimental import pallas as pl
from jax.experimental.pallas import tpu as pltpu  # noqa: F401  (kept for production-scale variants)

# ---- small synthetic "BERT" config ------------------------------------------------
B, S = 2, 8            # batch, sequence length
H, NH, DH = 32, 2, 16  # hidden, num heads, head dim
I = 64                 # intermediate (FFN) size
V = 128                # vocab size (lane friendly)
L = 2                  # number of encoder layers
T = B * S              # flattened token count
ZT = NH * T            # flattened (head, batch, seq) rows for attention
LN_EPS = 1e-12


# ---- in-kernel helpers (all f32 elementwise math -- v5e has no bf16 VPU/EUP) --------
def _layernorm(x, g, b):
    mu = jnp.mean(x, axis=-1, keepdims=True)
    var = jnp.mean((x - mu) ** 2, axis=-1, keepdims=True)
    return (x - mu) * jax.lax.rsqrt(var + LN_EPS) * g + b


def _softmax_last_approx(x):
    # Attention-internal softmax: approx reciprocal is fine here (EUP slot, ~free).
    m = jnp.max(x, axis=-1, keepdims=True)
    e = jnp.exp(x - m)
    return e * pl.reciprocal(jnp.sum(e, axis=-1, keepdims=True), approx=True)


def _gelu(x):
    # TODO(synk): HF BERT uses exact erf-GELU; tanh approximation used here for
    # guaranteed Mosaic lowering (EUP tanh).
    return jax.nn.gelu(x, approximate=True)


def _bf16(x):
    return x.astype(jnp.bfloat16)


# ---- the fused kernel ---------------------------------------------------------------
def fused_bert_kernel(x_emb_ref, bias_ref, misc_ref,
                      wqkv_ref, wo_ref, wi_ref, wo2_ref, lvec_ref,
                      wd_ref, wdec_ref, o_ref):
    misc = misc_ref[...]                              # [8, 128] f32 packed vectors
    emb_g, emb_b = misc[0:1, :H], misc[1:2, :H]

    # One-time embedding layernorm; activations stay live in vregs/VMEM throughout.
    x = _layernorm(x_emb_ref[...], emb_g, emb_b)      # [T, H] f32

    attn_bias = bias_ref[...]                         # [ZT, ZT] f32, layer-invariant
    scale = 1.0 / (DH ** 0.5)

    for l in range(L):                                # static unroll: one contiguous
        lv = lvec_ref[l]                              # region for the LLO scheduler
        bqkv = lv[0:1, :3 * H]
        bo   = lv[1:2, :H]
        ln1g, ln1b = lv[2:3, :H], lv[3:4, :H]
        bi   = lv[4:5, :I]
        bo2  = lv[5:6, :H]
        ln2g, ln2b = lv[6:7, :H], lv[7:8, :H]

        # ---- fused QKV projection (single MXU push, bf16 in / f32 accumulate) -----
        qkv = jnp.dot(_bf16(x), wqkv_ref[l],
                      preferred_element_type=jnp.float32) + bqkv        # [T, 3H]

        # Flatten heads into ROWS (row z = h*T + b*S + s): the whole multi-head
        # attention then becomes two plain 2-D matmuls, padding the MXU instead of
        # issuing per-head pushes.  Head/batch separation + key padding are handled
        # by the precomputed additive block-diagonal bias.
        q_flat = jnp.concatenate(
            [qkv[:, 0 * H + h * DH: 0 * H + (h + 1) * DH] for h in range(NH)], axis=0)
        k_flat = jnp.concatenate(
            [qkv[:, 1 * H + h * DH: 1 * H + (h + 1) * DH] for h in range(NH)], axis=0)
        v_flat = jnp.concatenate(
            [qkv[:, 2 * H + h * DH: 2 * H + (h + 1) * DH] for h in range(NH)], axis=0)

        q_flat = q_flat * scale                        # fold 1/sqrt(DH) into q (f32)

        s = jnp.einsum('qd,kd->qk', _bf16(q_flat), _bf16(k_flat),
                       preferred_element_type=jnp.float32) + attn_bias  # [ZT, ZT]
        p = _softmax_last_approx(s)
        ctx_flat = jnp.dot(_bf16(p), _bf16(v_flat),
                           preferred_element_type=jnp.float32)          # [ZT, DH]
        ctx = jnp.concatenate(
            [ctx_flat[h * T:(h + 1) * T, :] for h in range(NH)], axis=1)  # [T, H]

        attn_out = jnp.dot(_bf16(ctx), wo_ref[l],
                           preferred_element_type=jnp.float32) + bo
        h1 = _layernorm(x + attn_out, ln1g, ln1b)

        ff = _gelu(jnp.dot(_bf16(h1), wi_ref[l],
                           preferred_element_type=jnp.float32) + bi)
        ff_out = jnp.dot(_bf16(ff), wo2_ref[l],
                         preferred_element_type=jnp.float32) + bo2
        x = _layernorm(h1 + ff_out, ln2g, ln2b)

    # ---- MLM head + softmax over the SEQUENCE axis (dim=1, as in the PyTorch ref) --
    bd, hlng, hlnb, bdec = misc[2:3, :H], misc[3:4, :H], misc[4:5, :H], misc[5:6, :V]
    hh = _gelu(jnp.dot(_bf16(x), wd_ref[...],
                       preferred_element_type=jnp.float32) + bd)
    hh = _layernorm(hh, hlng, hlnb)
    logits = jnp.dot(_bf16(hh), wdec_ref[...],
                     preferred_element_type=jnp.float32) + bdec          # [T, V]
    lg = logits.reshape(B, S, V)
    m = jnp.max(lg, axis=1, keepdims=True)
    e = jnp.exp(lg - m)
    # Exact divide for the emitted probabilities (no approx reciprocal here).
    o_ref[...] = e / jnp.sum(e, axis=1, keepdims=True)


# ---- pallas_call wrapper ------------------------------------------------------------
def fused_forward(x_emb, attn_bias, packed):
    # No grid: everything (activations, all L layers' weights, the lane-dense
    # [B, S, 128] output) fits VMEM trivially at these sizes; one kernel region,
    # zero per-step grid/DMA bookkeeping.
    return pl.pallas_call(
        fused_bert_kernel,
        out_shape=jax.ShapeDtypeStruct((B, S, V), jnp.float32),
    )(x_emb, attn_bias, *packed)


# ---- parameter init (deterministic, synthetic -- no checkpoint load) ----------------
def init_params(key):
    keys = iter(jax.random.split(key, 128))

    def norm(shape, scale=0.02):
        return (scale * jax.random.normal(next(keys), shape)).astype(jnp.float32)

    params = {
        'word_emb': norm((V, H)),
        'pos_emb': norm((S, H)),
        'tok_emb': norm((2, H)),
        'emb_ln_g': jnp.ones((1, H), jnp.float32),
        'emb_ln_b': jnp.zeros((1, H), jnp.float32),
        'layers': [],
    }
    for _ in range(L):
        params['layers'].append({
            'wq': norm((H, H)), 'bq': jnp.zeros((1, H), jnp.float32),
            'wk': norm((H, H)), 'bk': jnp.zeros((1, H), jnp.float32),
            'wv': norm((H, H)), 'bv': jnp.zeros((1, H), jnp.float32),
            'wo': norm((H, H)), 'bo': jnp.zeros((1, H), jnp.float32),
            'ln1_g': jnp.ones((1, H), jnp.float32),
            'ln1_b': jnp.zeros((1, H), jnp.float32),
            'wi': norm((H, I)), 'bi': jnp.zeros((1, I), jnp.float32),
            'wo2': norm((I, H)), 'bo2': jnp.zeros((1, H), jnp.float32),
            'ln2_g': jnp.ones((1, H), jnp.float32),
            'ln2_b': jnp.zeros((1, H), jnp.float32),
        })
    params['head'] = {
        'wd': norm((H, H)), 'bd': jnp.zeros((1, H), jnp.float32),
        'ln_g': jnp.ones((1, H), jnp.float32),
        'ln_b': jnp.zeros((1, H), jnp.float32),
        # decoder weight tied to word embeddings (as in BertForMaskedLM)
        'wdec': params['word_emb'].T,                 # [H, V]
        'bdec': jnp.zeros((1, V), jnp.float32),
    }
    return params


def _row128(vec):
    """Pad a small vector into one 128-lane row."""
    v = vec.reshape(-1).astype(jnp.float32)
    return jnp.zeros((128,), jnp.float32).at[: v.shape[0]].set(v)


def pack_params(params):
    """Stack per-layer matmul weights [L, ...] (bf16); pack all small vectors into
    one [L, 8, 128] per-layer slab plus one [8, 128] misc slab (f32)."""
    ls = params['layers']

    wqkv = jnp.stack([jnp.concatenate([lp['wq'], lp['wk'], lp['wv']], axis=1)
                      for lp in ls]).astype(jnp.bfloat16)                 # [L, H, 3H]
    wo = jnp.stack([lp['wo'] for lp in ls]).astype(jnp.bfloat16)          # [L, H, H]
    wi = jnp.stack([lp['wi'] for lp in ls]).astype(jnp.bfloat16)          # [L, H, I]
    wo2 = jnp.stack([lp['wo2'] for lp in ls]).astype(jnp.bfloat16)        # [L, I, H]

    lvecs = jnp.stack([jnp.stack([
        _row128(jnp.concatenate([lp['bq'], lp['bk'], lp['bv']], axis=1)),  # row 0
        _row128(lp['bo']),                                                 # row 1
        _row128(lp['ln1_g']), _row128(lp['ln1_b']),                        # rows 2,3
        _row128(lp['bi']),                                                 # row 4
        _row128(lp['bo2']),                                                # row 5
        _row128(lp['ln2_g']), _row128(lp['ln2_b']),                        # rows 6,7
    ]) for lp in ls])                                                      # [L, 8, 128]

    head = params['head']
    misc = jnp.stack([
        _row128(params['emb_ln_g']), _row128(params['emb_ln_b']),          # rows 0,1
        _row128(head['bd']),                                               # row 2
        _row128(head['ln_g']), _row128(head['ln_b']),                      # rows 3,4
        _row128(head['bdec']),                                             # row 5
        jnp.zeros((128,), jnp.float32), jnp.zeros((128,), jnp.float32),    # pad
    ])                                                                     # [8, 128]

    return (misc, wqkv, wo, wi, wo2, lvecs,
            head['wd'].astype(jnp.bfloat16), head['wdec'].astype(jnp.bfloat16))


def _make_attn_bias(attention_mask):
    """Additive bias for the flattened [ZT, ZT] score matrix: 0 where the query and
    key share (head, batch) AND the key is unmasked; large-negative otherwise."""
    neg = jnp.finfo(jnp.float32).min / 2
    z = jnp.arange(ZT)
    h_idx = z // T
    b_idx = (z % T) // S
    same_block = (h_idx[:, None] == h_idx[None, :]) & (b_idx[:, None] == b_idx[None, :])
    key_ok = jnp.tile(attention_mask.reshape(T).astype(bool), NH)          # [ZT]
    valid = same_block & key_ok[None, :]
    return jnp.where(valid, 0.0, neg).astype(jnp.float32)


# ---- full forward (embedding gathers are glue; everything else in ONE kernel) ------
def _automl_forward_impl(params, input_ids, token_type_ids, attention_mask):
    packed = pack_params(params)
    pos = jnp.arange(S)
    x = (params['word_emb'][input_ids]
         + params['pos_emb'][pos][None, :, :]
         + params['tok_emb'][token_type_ids]).astype(jnp.float32)         # [B, S, H]
    x2d = x.reshape(T, H)                                                  # [B*S, H]
    attn_bias = _make_attn_bias(attention_mask)                            # [ZT, ZT]
    return fused_forward(x2d, attn_bias, packed)                           # [B, S, V]


automl_forward = jax.jit(_automl_forward_impl)


if __name__ == "__main__":
    key = jax.random.PRNGKey(0)
    kp, ki, kt = jax.random.split(key, 3)

    params = init_params(kp)

    input_ids = jax.random.randint(ki, (B, S), 0, V, dtype=jnp.int32)
    token_type_ids = jax.random.randint(kt, (B, S), 0, 2, dtype=jnp.int32)
    attention_mask = jnp.ones((B, S), dtype=jnp.int32).at[1, S - 2:].set(0)

    probs = automl_forward(params, input_ids, token_type_ids, attention_mask)
    probs = jax.block_until_ready(probs)

    assert probs.shape == (B, S, V)
    print("KERNEL_OK")
</pallas_src>

<mosaic_0001>
module attributes {stable_mosaic.version = 11 : i64} {
  func.func @fused_bert_kernel(%arg0: memref<16x32xf32, #tpu.memory_space<vmem>>, %arg1: memref<32x32xf32, #tpu.memory_space<vmem>>, %arg2: memref<8x128xf32, #tpu.memory_space<vmem>>, %arg3: memref<2x32x96xbf16, #tpu.memory_space<vmem>>, %arg4: memref<2x32x32xbf16, #tpu.memory_space<vmem>>, %arg5: memref<2x32x64xbf16, #tpu.memory_space<vmem>>, %arg6: memref<2x64x32xbf16, #tpu.memory_space<vmem>>, %arg7: memref<2x8x128xf32, #tpu.memory_space<vmem>>, %arg8: memref<32x32xbf16, #tpu.memory_space<vmem>>, %arg9: memref<32x128xbf16, #tpu.memory_space<vmem>>, %arg10: memref<2x8x128xf32, #tpu.memory_space<vmem>>) attributes {dimension_semantics = [], scalar_prefetch = 0 : i64, scratch_operands = 0 : i64, tpu.core_type = #tpu.core_type<tc>} {
    %c0 = arith.constant 0 : index
    %c0_0 = arith.constant 0 : index
    %0 = vector.load %arg2[%c0, %c0_0] : memref<8x128xf32, #tpu.memory_space<vmem>>, vector<8x128xf32>
    %1 = vector.extract_strided_slice %0 {offsets = [0, 0], sizes = [1, 32], strides = [1, 1]} : vector<8x128xf32> to vector<1x32xf32>
    %2 = vector.extract_strided_slice %0 {offsets = [1, 0], sizes = [1, 32], strides = [1, 1]} : vector<8x128xf32> to vector<1x32xf32>
    %c0_1 = arith.constant 0 : index
    %c0_2 = arith.constant 0 : index
    %3 = vector.load %arg0[%c0_1, %c0_2] : memref<16x32xf32, #tpu.memory_space<vmem>>, vector<16x32xf32>
    %cst = arith.constant dense<0.000000e+00> : vector<16xf32>
    %4 = vector.multi_reduction <add>, %3, %cst [1] : vector<16x32xf32> to vector<16xf32>
    %5 = vector.shape_cast %4 : vector<16xf32> to vector<16x1xf32>
    %cst_3 = arith.constant 3.200000e+01 : f32
    %6 = vector.broadcast %cst_3 : f32 to vector<16x1xf32>
    %7 = arith.divf %5, %6 : vector<16x1xf32>
    %8 = vector.broadcast %7 : vector<16x1xf32> to vector<16x32xf32>
    %9 = arith.subf %3, %8 : vector<16x32xf32>
    %10 = arith.mulf %9, %9 : vector<16x32xf32>
    %cst_4 = arith.constant dense<0.000000e+00> : vector<16xf32>
    %11 = vector.multi_reduction <add>, %10, %cst_4 [1] : vector<16x32xf32> to vector<16xf32>
    %12 = vector.shape_cast %11 : vector<16xf32> to vector<16x1xf32>
    %cst_5 = arith.constant 3.200000e+01 : f32
    %13 = vector.broadcast %cst_5 : f32 to vector<16x1xf32>
    %14 = arith.divf %12, %13 : vector<16x1xf32>
    %15 = vector.broadcast %7 : vector<16x1xf32> to vector<16x32xf32>
    %16 = arith.subf %3, %15 : vector<16x32xf32>
    %cst_6 = arith.constant 9.99999996E-13 : f32
    %17 = vector.broadcast %cst_6 : f32 to vector<16x1xf32>
    %18 = arith.addf %14, %17 : vector<16x1xf32>
    %19 = math.rsqrt %18 : vector<16x1xf32>
    %20 = vector.broadcast %19 : vector<16x1xf32> to vector<16x32xf32>
    %21 = arith.mulf %16, %20 : vector<16x32xf32>
    %22 = vector.broadcast %1 : vector<1x32xf32> to vector<16x32xf32>
    %23 = arith.mulf %21, %22 : vector<16x32xf32>
    %24 = vector.broadcast %2 : vector<1x32xf32> to vector<16x32xf32>
    %25 = arith.addf %23, %24 : vector<16x32xf32>
    %c0_7 = arith.constant 0 : index
    %c0_8 = arith.constant 0 : index
    %26 = vector.load %arg1[%c0_7, %c0_8] : memref<32x32xf32, #tpu.memory_space<vmem>>, vector<32x32xf32>
    %c0_9 = arith.constant 0 : index
    %c0_10 = arith.constant 0 : index
    %c0_11 = arith.constant 0 : index
    %27 = vector.load %arg7[%c0_9, %c0_10, %c0_11] : memref<2x8x128xf32, #tpu.memory_space<vmem>>, vector<1x8x128xf32>
    %28 = vector.shape_cast %27 : vector<1x8x128xf32> to vector<8x128xf32>
    %29 = vector.extract_strided_slice %28 {offsets = [0, 0], sizes = [1, 96], strides = [1, 1]} : vector<8x128xf32> to vector<1x96xf32>
    %30 = vector.extract_strided_slice %28 {offsets = [1, 0], sizes = [1, 32], strides = [1, 1]} : vector<8x128xf32> to vector<1x32xf32>
    %31 = vector.extract_strided_slice %28 {offsets = [2, 0], sizes = [1, 32], strides = [1, 1]} : vector<8x128xf32> to vector<1x32xf32>
    %32 = vector.extract_strided_slice %28 {offsets = [3, 0], sizes = [1, 32], strides = [1, 1]} : vector<8x128xf32> to vector<1x32xf32>
    %33 = vector.extract_strided_slice %28 {offsets = [4, 0], sizes = [1, 64], strides = [1, 1]} : vector<8x128xf32> to vector<1x64xf32>
    %34 = vector.extract_strided_slice %28 {offsets = [5, 0], sizes = [1, 32], strides = [1, 1]} : vector<8x128xf32> to vector<1x32xf32>
    %35 = vector.extract_strided_slice %28 {offsets = [6, 0], sizes = [1, 32], strides = [1, 1]} : vector<8x128xf32> to vector<1x32xf32>
    %36 = vector.extract_strided_slice %28 {offsets = [7, 0], sizes = [1, 32], strides = [1, 1]} : vector<8x128xf32> to vector<1x32xf32>
    %37 = arith.truncf %25 : vector<16x32xf32> to vector<16x32xbf16>
    %c0_12 = arith.constant 0 : index
    %c0_13 = arith.constant 0 : index
    %c0_14 = arith.constant 0 : index
    %38 = vector.load %arg3[%c0_12, %c0_13, %c0_14] : memref<2x32x96xbf16, #tpu.memory_space<vmem>>, vector<1x32x96xbf16>
    %39 = vector.shape_cast %38 : vector<1x32x96xbf16> to vector<32x96xbf16>
    %cst_15 = arith.constant dense<0.000000e+00> : vector<16x96xf32>
    %40 = tpu.matmul %37, %39, %cst_15 {dimension_numbers = #tpu.dot_dimension_numbers<[1], [0], [0], [1], [0, 0, 1, 1], [], []>} : vector<16x32xbf16>, vector<32x96xbf16>, vector<16x96xf32> -> vector<16x96xf32>
    %41 = vector.broadcast %29 : vector<1x96xf32> to vector<16x96xf32>
    %42 = arith.addf %40, %41 : vector<16x96xf32>
    %43 = vector.extract_strided_slice %42 {offsets = [0, 0], sizes = [16, 16], strides = [1, 1]} : vector<16x96xf32> to vector<16x16xf32>
    %44 = vector.extract_strided_slice %42 {offsets = [0, 16], sizes = [16, 16], strides = [1, 1]} : vector<16x96xf32> to vector<16x16xf32>
    %45 = tpu.concatenate %43, %44 in 0 : vector<16x16xf32>, vector<16x16xf32> -> vector<32x16xf32>
    %46 = vector.extract_strided_slice %42 {offsets = [0, 32], sizes = [16, 16], strides = [1, 1]} : vector<16x96xf32> to vector<16x16xf32>
    %47 = vector.extract_strided_slice %42 {offsets = [0, 48], sizes = [16, 16], strides = [1, 1]} : vector<16x96xf32> to vector<16x16xf32>
    %48 = tpu.concatenate %46, %47 in 0 : vector<16x16xf32>, vector<16x16xf32> -> vector<32x16xf32>
    %49 = vector.extract_strided_slice %42 {offsets = [0, 64], sizes = [16, 16], strides = [1, 1]} : vector<16x96xf32> to vector<16x16xf32>
    %50 = vector.extract_strided_slice %42 {offsets = [0, 80], sizes = [16, 16], strides = [1, 1]} : vector<16x96xf32> to vector<16x16xf32>
    %51 = tpu.concatenate %49, %50 in 0 : vector<16x16xf32>, vector<16x16xf32> -> vector<32x16xf32>
    %cst_16 = arith.constant 2.500000e-01 : f32
    %52 = vector.broadcast %cst_16 : f32 to vector<32x16xf32>
    %53 = arith.mulf %45, %52 : vector<32x16xf32>
    %54 = arith.truncf %53 : vector<32x16xf32> to vector<32x16xbf16>
    %55 = arith.truncf %48 : vector<32x16xf32> to vector<32x16xbf16>
    "tpu.trace_start"() <{level = 10 : i32, message = "qd,kd->qk"}> : () -> ()
    %cst_17 = arith.constant dense<0.000000e+00> : vector<32x32xf32>
    %56 = tpu.matmul %54, %55, %cst_17 {dimension_numbers = #tpu.dot_dimension_numbers<[1], [1], [0], [0], [0, 0, 1, 0], [], []>} : vector<32x16xbf16>, vector<32x16xbf16>, vector<32x32xf32> -> vector<32x32xf32>
    "tpu.trace_stop"() : () -> ()
    %57 = arith.addf %56, %26 : vector<32x32xf32>
    %cst_18 = arith.constant dense<0xFF800000> : vector<32xf32>
    %58 = vector.multi_reduction <maximumf>, %57, %cst_18 [1] : vector<32x32xf32> to vector<32xf32>
    %59 = vector.shape_cast %58 : vector<32xf32> to vector<32x1xf32>
    %60 = vector.broadcast %59 : vector<32x1xf32> to vector<32x32xf32>
    %61 = arith.subf %57, %60 : vector<32x32xf32>
    %62 = math.exp %61 : vector<32x32xf32>
    %cst_19 = arith.constant dense<0.000000e+00> : vector<32xf32>
    %63 = vector.multi_reduction <add>, %62, %cst_19 [1] : vector<32x32xf32> to vector<32xf32>
    %64 = vector.shape_cast %63 : vector<32xf32> to vector<32x1xf32>
    %65 = tpu.reciprocal %64 {approx = true} : vector<32x1xf32> -> vector<32x1xf32>
    %66 = vector.broadcast %65 : vector<32x1xf32> to vector<32x32xf32>
    %67 = arith.mulf %62, %66 : vector<32x32xf32>
    %68 = arith.truncf %67 : vector<32x32xf32> to vector<32x32xbf16>
    %69 = arith.truncf %51 : vector<32x16xf32> to vector<32x16xbf16>
    %cst_20 = arith.constant dense<0.000000e+00> : vector<32x16xf32>
    %70 = tpu.matmul %68, %69, %cst_20 {dimension_numbers = #tpu.dot_dimension_numbers<[1], [0], [0], [1], [0, 0, 1, 1], [], []>} : vector<32x32xbf16>, vector<32x16xbf16>, vector<32x16xf32> -> vector<32x16xf32>
    %71 = vector.extract_strided_slice %70 {offsets = [0, 0], sizes = [16, 16], strides = [1, 1]} : vector<32x16xf32> to vector<16x16xf32>
    %72 = vector.extract_strided_slice %70 {offsets = [16, 0], sizes = [16, 16], strides = [1, 1]} : vector<32x16xf32> to vector<16x16xf32>
    %73 = tpu.concatenate %71, %72 in 1 : vector<16x16xf32>, vector<16x16xf32> -> vector<16x32xf32>
    %74 = arith.truncf %73 : vector<16x32xf32> to vector<16x32xbf16>
    %c0_21 = arith.constant 0 : index
    %c0_22 = arith.constant 0 : index
    %c0_23 = arith.constant 0 : index
    %75 = vector.load %arg4[%c0_21, %c0_22, %c0_23] : memref<2x32x32xbf16, #tpu.memory_space<vmem>>, vector<1x32x32xbf16>
    %76 = vector.shape_cast %75 : vector<1x32x32xbf16> to vector<32x32xbf16>
    %cst_24 = arith.constant dense<0.000000e+00> : vector<16x32xf32>
    %77 = tpu.matmul %74, %76, %cst_24 {dimension_numbers = #tpu.dot_dimension_numbers<[1], [0], [0], [1], [0, 0, 1, 1], [], []>} : vector<16x32xbf16>, vector<32x32xbf16>, vector<16x32xf32> -> vector<16x32xf32>
    %78 = vector.broadcast %30 : vector<1x32xf32> to vector<16x32xf32>
    %79 = arith.addf %77, %78 : vector<16x32xf32>
    %80 = arith.addf %25, %79 : vector<16x32xf32>
    %cst_25 = arith.constant dense<0.000000e+00> : vector<16xf32>
    %81 = vector.multi_reduction <add>, %80, %cst_25 [1] : vector<16x32xf32> to vector<16xf32>
    %82 = vector.shape_cast %81 : vector<16xf32> to vector<16x1xf32>
    %cst_26 = arith.constant 3.200000e+01 : f32
    %83 = vector.broadcast %cst_26 : f32 to vector<16x1xf32>
    %84 = arith.divf %82, %83 : vector<16x1xf32>
    %85 = vector.broadcast %84 : vector<16x1xf32> to vector<16x32xf32>
    %86 = arith.subf %80, %85 : vector<16x32xf32>
    %87 = arith.mulf %86, %86 : vector<16x32xf32>
    %cst_27 = arith.constant dense<0.000000e+00> : vector<16xf32>
    %88 = vector.multi_reduction <add>, %87, %cst_27 [1] : vector<16x32xf32> to vector<16xf32>
    %89 = vector.shape_cast %88 : vector<16xf32> to vector<16x1xf32>
    %cst_28 = arith.constant 3.200000e+01 : f32
    %90 = vector.broadcast %cst_28 : f32 to vector<16x1xf32>
    %91 = arith.divf %89, %90 : vector<16x1xf32>
    %92 = vector.broadcast %84 : vector<16x1xf32> to vector<16x32xf32>
    %93 = arith.subf %80, %92 : vector<16x32xf32>
    %cst_29 = arith.constant 9.99999996E-13 : f32
    %94 = vector.broadcast %cst_29 : f32 to vector<16x1xf32>
    %95 = arith.addf %91, %94 : vector<16x1xf32>
    %96 = math.rsqrt %95 : vector<16x1xf32>
    %97 = vector.broadcast %96 : vector<16x1xf32> to vector<16x32xf32>
    %98 = arith.mulf %93, %97 : vector<16x32xf32>
    %99 = vector.broadcast %31 : vector<1x32xf32> to vector<16x32xf32>
    %100 = arith.mulf %98, %99 : vector<16x32xf32>
    %101 = vector.broadcast %32 : vector<1x32xf32> to vector<16x32xf32>
    %102 = arith.addf %100, %101 : vector<16x32xf32>
    %103 = arith.truncf %102 : vector<16x32xf32> to vector<16x32xbf16>
    %c0_30 = arith.constant 0 : index
    %c0_31 = arith.constant 0 : index
    %c0_32 = arith.constant 0 : index
    %104 = vector.load %arg5[%c0_30, %c0_31, %c0_32] : memref<2x32x64xbf16, #tpu.memory_space<vmem>>, vector<1x32x64xbf16>
    %105 = vector.shape_cast %104 : vector<1x32x64xbf16> to vector<32x64xbf16>
    %cst_33 = arith.constant dense<0.000000e+00> : vector<16x64xf32>
    %106 = tpu.matmul %103, %105, %cst_33 {dimension_numbers = #tpu.dot_dimension_numbers<[1], [0], [0], [1], [0, 0, 1, 1], [], []>} : vector<16x32xbf16>, vector<32x64xbf16>, vector<16x64xf32> -> vector<16x64xf32>
    %107 = vector.broadcast %33 : vector<1x64xf32> to vector<16x64xf32>
    %108 = arith.addf %106, %107 : vector<16x64xf32>
    %109 = arith.mulf %108, %108 : vector<16x64xf32>
    %110 = arith.mulf %108, %109 : vector<16x64xf32>
    %cst_34 = arith.constant 4.471500e-02 : f32
    %111 = vector.broadcast %cst_34 : f32 to vector<16x64xf32>
    %112 = arith.mulf %111, %110 : vector<16x64xf32>
    %113 = arith.addf %108, %112 : vector<16x64xf32>
    %cst_35 = arith.constant 0.797884583 : f32
    %114 = vector.broadcast %cst_35 : f32 to vector<16x64xf32>
    %115 = arith.mulf %114, %113 : vector<16x64xf32>
    %116 = math.tanh %115 : vector<16x64xf32>
    %cst_36 = arith.constant 1.000000e+00 : f32
    %117 = vector.broadcast %cst_36 : f32 to vector<16x64xf32>
    %118 = arith.addf %117, %116 : vector<16x64xf32>
    %cst_37 = arith.constant 5.000000e-01 : f32
    %119 = vector.broadcast %cst_37 : f32 to vector<16x64xf32>
    %120 = arith.mulf %119, %118 : vector<16x64xf32>
    %121 = arith.mulf %108, %120 : vector<16x64xf32>
    %122 = arith.truncf %121 : vector<16x64xf32> to vector<16x64xbf16>
    %c0_38 = arith.constant 0 : index
    %c0_39 = arith.constant 0 : index
    %c0_40 = arith.constant 0 : index
    %123 = vector.load %arg6[%c0_38, %c0_39, %c0_40] : memref<2x64x32xbf16, #tpu.memory_space<vmem>>, vector<1x64x32xbf16>
    %124 = vector.shape_cast %123 : vector<1x64x32xbf16> to vector<64x32xbf16>
    %cst_41 = arith.constant dense<0.000000e+00> : vector<16x32xf32>
    %125 = tpu.matmul %122, %124, %cst_41 {dimension_numbers = #tpu.dot_dimension_numbers<[1], [0], [0], [1], [0, 0, 1, 1], [], []>} : vector<16x64xbf16>, vector<64x32xbf16>, vector<16x32xf32> -> vector<16x32xf32>
    %126 = vector.broadcast %34 : vector<1x32xf32> to vector<16x32xf32>
    %127 = arith.addf %125, %126 : vector<16x32xf32>
    %128 = arith.addf %102, %127 : vector<16x32xf32>
    %cst_42 = arith.constant dense<0.000000e+00> : vector<16xf32>
    %129 = vector.multi_reduction <add>, %128, %cst_42 [1] : vector<16x32xf32> to vector<16xf32>
    %130 = vector.shape_cast %129 : vector<16xf32> to vector<16x1xf32>
    %cst_43 = arith.constant 3.200000e+01 : f32
    %131 = vector.broadcast %cst_43 : f32 to vector<16x1xf32>
    %132 = arith.divf %130, %131 : vector<16x1xf32>
    %133 = vector.broadcast %132 : vector<16x1xf32> to vector<16x32xf32>
    %134 = arith.subf %128, %133 : vector<16x32xf32>
    %135 = arith.mulf %134, %134 : vector<16x32xf32>
    %cst_44 = arith.constant dense<0.000000e+00> : vector<16xf32>
    %136 = vector.multi_reduction <add>, %135, %cst_44 [1] : vector<16x32xf32> to vector<16xf32>
    %137 = vector.shape_cast %136 : vector<16xf32> to vector<16x1xf32>
    %cst_45 = arith.constant 3.200000e+01 : f32
    %138 = vector.broadcast %cst_45 : f32 to vector<16x1xf32>
    %139 = arith.divf %137, %138 : vector<16x1xf32>
    %140 = vector.broadcast %132 : vector<16x1xf32> to vector<16x32xf32>
    %141 = arith.subf %128, %140 : vector<16x32xf32>
    %cst_46 = arith.constant 9.99999996E-13 : f32
    %142 = vector.broadcast %cst_46 : f32 to vector<16x1xf32>
    %143 = arith.addf %139, %142 : vector<16x1xf32>
    %144 = math.rsqrt %143 : vector<16x1xf32>
    %145 = vector.broadcast %144 : vector<16x1xf32> to vector<16x32xf32>
    %146 = arith.mulf %141, %145 : vector<16x32xf32>
    %147 = vector.broadcast %35 : vector<1x32xf32> to vector<16x32xf32>
    %148 = arith.mulf %146, %147 : vector<16x32xf32>
    %149 = vector.broadcast %36 : vector<1x32xf32> to vector<16x32xf32>
    %150 = arith.addf %148, %149 : vector<16x32xf32>
    %c1 = arith.constant 1 : index
    %c0_47 = arith.constant 0 : index
    %c0_48 = arith.constant 0 : index
    %151 = vector.load %arg7[%c1, %c0_47, %c0_48] : memref<2x8x128xf32, #tpu.memory_space<vmem>>, vector<1x8x128xf32>
    %152 = vector.shape_cast %151 : vector<1x8x128xf32> to vector<8x128xf32>
    %153 = vector.extract_strided_slice %152 {offsets = [0, 0], sizes = [1, 96], strides = [1, 1]} : vector<8x128xf32> to vector<1x96xf32>
    %154 = vector.extract_strided_slice %152 {offsets = [1, 0], sizes = [1, 32], strides = [1, 1]} : vector<8x128xf32> to vector<1x32xf32>
    %155 = vector.extract_strided_slice %152 {offsets = [2, 0], sizes = [1, 32], strides = [1, 1]} : vector<8x128xf32> to vector<1x32xf32>
    %156 = vector.extract_strided_slice %152 {offsets = [3, 0], sizes = [1, 32], strides = [1, 1]} : vector<8x128xf32> to vector<1x32xf32>
    %157 = vector.extract_strided_slice %152 {offsets = [4, 0], sizes = [1, 64], strides = [1, 1]} : vector<8x128xf32> to vector<1x64xf32>
    %158 = vector.extract_strided_slice %152 {offsets = [5, 0], sizes = [1, 32], strides = [1, 1]} : vector<8x128xf32> to vector<1x32xf32>
    %159 = vector.extract_strided_slice %152 {offsets = [6, 0], sizes = [1, 32], strides = [1, 1]} : vector<8x128xf32> to vector<1x32xf32>
    %160 = vector.extract_strided_slice %152 {offsets = [7, 0], sizes = [1, 32], strides = [1, 1]} : vector<8x128xf32> to vector<1x32xf32>
    %161 = arith.truncf %150 : vector<16x32xf32> to vector<16x32xbf16>
    %c1_49 = arith.constant 1 : index
    %c0_50 = arith.constant 0 : index
    %c0_51 = arith.constant 0 : index
    %162 = vector.load %arg3[%c1_49, %c0_50, %c0_51] : memref<2x32x96xbf16, #tpu.memory_space<vmem>>, vector<1x32x96xbf16>
    %163 = vector.shape_cast %162 : vector<1x32x96xbf16> to vector<32x96xbf16>
    %cst_52 = arith.constant dense<0.000000e+00> : vector<16x96xf32>
    %164 = tpu.matmul %161, %163, %cst_52 {dimension_numbers = #tpu.dot_dimension_numbers<[1], [0], [0], [1], [0, 0, 1, 1], [], []>} : vector<16x32xbf16>, vector<32x96xbf16>, vector<16x96xf32> -> vector<16x96xf32>
    %165 = vector.broadcast %153 : vector<1x96xf32> to vector<16x96xf32>
    %166 = arith.addf %164, %165 : vector<16x96xf32>
    %167 = vector.extract_strided_slice %166 {offsets = [0, 0], sizes = [16, 16], strides = [1, 1]} : vector<16x96xf32> to vector<16x16xf32>
    %168 = vector.extract_strided_slice %166 {offsets = [0, 16], sizes = [16, 16], strides = [1, 1]} : vector<16x96xf32> to vector<16x16xf32>
    %169 = tpu.concatenate %167, %168 in 0 : vector<16x16xf32>, vector<16x16xf32> -> vector<32x16xf32>
    %170 = vector.extract_strided_slice %166 {offsets = [0, 32], sizes = [16, 16], strides = [1, 1]} : vector<16x96xf32> to vector<16x16xf32>
    %171 = vector.extract_strided_slice %166 {offsets = [0, 48], sizes = [16, 16], strides = [1, 1]} : vector<16x96xf32> to vector<16x16xf32>
    %172 = tpu.concatenate %170, %171 in 0 : vector<16x16xf32>, vector<16x16xf32> -> vector<32x16xf32>
    %173 = vector.extract_strided_slice %166 {offsets = [0, 64], sizes = [16, 16], strides = [1, 1]} : vector<16x96xf32> to vector<16x16xf32>
    %174 = vector.extract_strided_slice %166 {offsets = [0, 80], sizes = [16, 16], strides = [1, 1]} : vector<16x96xf32> to vector<16x16xf32>
    %175 = tpu.concatenate %173, %174 in 0 : vector<16x16xf32>, vector<16x16xf32> -> vector<32x16xf32>
    %cst_53 = arith.constant 2.500000e-01 : f32
    %176 = vector.broadcast %cst_53 : f32 to vector<32x16xf32>
    %177 = arith.mulf %169, %176 : vector<32x16xf32>
    %178 = arith.truncf %177 : vector<32x16xf32> to vector<32x16xbf16>
    %179 = arith.truncf %172 : vector<32x16xf32> to vector<32x16xbf16>
    "tpu.trace_start"() <{level = 10 : i32, message = "qd,kd->qk"}> : () -> ()
    %cst_54 = arith.constant dense<0.000000e+00> : vector<32x32xf32>
    %180 = tpu.matmul %178, %179, %cst_54 {dimension_numbers = #tpu.dot_dimension_numbers<[1], [1], [0], [0], [0, 0, 1, 0], [], []>} : vector<32x16xbf16>, vector<32x16xbf16>, vector<32x32xf32> -> vector<32x32xf32>
    "tpu.trace_stop"() : () -> ()
    %181 = arith.addf %180, %26 : vector<32x32xf32>
    %cst_55 = arith.constant dense<0xFF800000> : vector<32xf32>
    %182 = vector.multi_reduction <maximumf>, %181, %cst_55 [1] : vector<32x32xf32> to vector<32xf32>
    %183 = vector.shape_cast %182 : vector<32xf32> to vector<32x1xf32>
    %184 = vector.broadcast %183 : vector<32x1xf32> to vector<32x32xf32>
    %185 = arith.subf %181, %184 : vector<32x32xf32>
    %186 = math.exp %185 : vector<32x32xf32>
    %cst_56 = arith.constant dense<0.000000e+00> : vector<32xf32>
    %187 = vector.multi_reduction <add>, %186, %cst_56 [1] : vector<32x32xf32> to vector<32xf32>
    %188 = vector.shape_cast %187 : vector<32xf32> to vector<32x1xf32>
    %189 = tpu.reciprocal %188 {approx = true} : vector<32x1xf32> -> vector<32x1xf32>
    %190 = vector.broadcast %189 : vector<32x1xf32> to vector<32x32xf32>
    %191 = arith.mulf %186, %190 : vector<32x32xf32>
    %192 = arith.truncf %191 : vector<32x32xf32> to vector<32x32xbf16>
    %193 = arith.truncf %175 : vector<32x16xf32> to vector<32x16xbf16>
    %cst_57 = arith.constant dense<0.000000e+00> : vector<32x16xf32>
    %194 = tpu.matmul %192, %193, %cst_57 {dimension_numbers = #tpu.dot_dimension_numbers<[1], [0], [0], [1], [0, 0, 1, 1], [], []>} : vector<32x32xbf16>, vector<32x16xbf16>, vector<32x16xf32> -> vector<32x16xf32>
    %195 = vector.extract_strided_slice %194 {offsets = [0, 0], sizes = [16, 16], strides = [1, 1]} : vector<32x16xf32> to vector<16x16xf32>
    %196 = vector.extract_strided_slice %194 {offsets = [16, 0], sizes = [16, 16], strides = [1, 1]} : vector<32x16xf32> to vector<16x16xf32>
    %197 = tpu.concatenate %195, %196 in 1 : vector<16x16xf32>, vector<16x16xf32> -> vector<16x32xf32>
    %198 = arith.truncf %197 : vector<16x32xf32> to vector<16x32xbf16>
    %c1_58 = arith.constant 1 : index
    %c0_59 = arith.constant 0 : index
    %c0_60 = arith.constant 0 : index
    %199 = vector.load %arg4[%c1_58, %c0_59, %c0_60] : memref<2x32x32xbf16, #tpu.memory_space<vmem>>, vector<1x32x32xbf16>
    %200 = vector.shape_cast %199 : vector<1x32x32xbf16> to vector<32x32xbf16>
    %cst_61 = arith.constant dense<0.000000e+00> : vector<16x32xf32>
    %201 = tpu.matmul %198, %200, %cst_61 {dimension_numbers = #tpu.dot_dimension_numbers<[1], [0], [0], [1], [0, 0, 1, 1], [], []>} : vector<16x32xbf16>, vector<32x32xbf16>, vector<16x32xf32> -> vector<16x32xf32>
    %202 = vector.broadcast %154 : vector<1x32xf32> to vector<16x32xf32>
    %203 = arith.addf %201, %202 : vector<16x32xf32>
    %204 = arith.addf %150, %203 : vector<16x32xf32>
    %cst_62 = arith.constant dense<0.000000e+00> : vector<16xf32>
    %205 = vector.multi_reduction <add>, %204, %cst_62 [1] : vector<16x32xf32> to vector<16xf32>
    %206 = vector.shape_cast %205 : vector<16xf32> to vector<16x1xf32>
    %cst_63 = arith.constant 3.200000e+01 : f32
    %207 = vector.broadcast %cst_63 : f32 to vector<16x1xf32>
    %208 = arith.divf %206, %207 : vector<16x1xf32>
    %209 = vector.broadcast %208 : vector<16x1xf32> to vector<16x32xf32>
    %210 = arith.subf %204, %209 : vector<16x32xf32>
    %211 = arith.mulf %210, %210 : vector<16x32xf32>
    %cst_64 = arith.constant dense<0.000000e+00> : vector<16xf32>
    %212 = vector.multi_reduction <add>, %211, %cst_64 [1] : vector<16x32xf32> to vector<16xf32>
    %213 = vector.shape_cast %212 : vector<16xf32> to vector<16x1xf32>
    %cst_65 = arith.constant 3.200000e+01 : f32
    %214 = vector.broadcast %cst_65 : f32 to vector<16x1xf32>
    %215 = arith.divf %213, %214 : vector<16x1xf32>
    %216 = vector.broadcast %208 : vector<16x1xf32> to vector<16x32xf32>
    %217 = arith.subf %204, %216 : vector<16x32xf32>
    %cst_66 = arith.constant 9.99999996E-13 : f32
    %218 = vector.broadcast %cst_66 : f32 to vector<16x1xf32>
    %219 = arith.addf %215, %218 : vector<16x1xf32>
    %220 = math.rsqrt %219 : vector<16x1xf32>
    %221 = vector.broadcast %220 : vector<16x1xf32> to vector<16x32xf32>
    %222 = arith.mulf %217, %221 : vector<16x32xf32>
    %223 = vector.broadcast %155 : vector<1x32xf32> to vector<16x32xf32>
    %224 = arith.mulf %222, %223 : vector<16x32xf32>
    %225 = vector.broadcast %156 : vector<1x32xf32> to vector<16x32xf32>
    %226 = arith.addf %224, %225 : vector<16x32xf32>
    %227 = arith.truncf %226 : vector<16x32xf32> to vector<16x32xbf16>
    %c1_67 = arith.constant 1 : index
    %c0_68 = arith.constant 0 : index
    %c0_69 = arith.constant 0 : index
    %228 = vector.load %arg5[%c1_67, %c0_68, %c0_69] : memref<2x32x64xbf16, #tpu.memory_space<vmem>>, vector<1x32x64xbf16>
    %229 = vector.shape_cast %228 : vector<1x32x64xbf16> to vector<32x64xbf16>
    %cst_70 = arith.constant dense<0.000000e+00> : vector<16x64xf32>
    %230 = tpu.matmul %227, %229, %cst_70 {dimension_numbers = #tpu.dot_dimension_numbers<[1], [0], [0], [1], [0, 0, 1, 1], [], []>} : vector<16x32xbf16>, vector<32x64xbf16>, vector<16x64xf32> -> vector<16x64xf32>
    %231 = vector.broadcast %157 : vector<1x64xf32> to vector<16x64xf32>
    %232 = arith.addf %230, %231 : vector<16x64xf32>
    %233 = arith.mulf %232, %232 : vector<16x64xf32>
    %234 = arith.mulf %232, %233 : vector<16x64xf32>
    %cst_71 = arith.constant 4.471500e-02 : f32
    %235 = vector.broadcast %cst_71 : f32 to vector<16x64xf32>
    %236 = arith.mulf %235, %234 : vector<16x64xf32>
    %237 = arith.addf %232, %236 : vector<16x64xf32>
    %cst_72 = arith.constant 0.797884583 : f32
    %238 = vector.broadcast %cst_72 : f32 to vector<16x64xf32>
    %239 = arith.mulf %238, %237 : vector<16x64xf32>
    %240 = math.tanh %239 : vector<16x64xf32>
    %cst_73 = arith.constant 1.000000e+00 : f32
    %241 = vector.broadcast %cst_73 : f32 to vector<16x64xf32>
    %242 = arith.addf %241, %240 : vector<16x64xf32>
    %cst_74 = arith.constant 5.000000e-01 : f32
    %243 = vector.broadcast %cst_74 : f32 to vector<16x64xf32>
    %244 = arith.mulf %243, %242 : vector<16x64xf32>
    %245 = arith.mulf %232, %244 : vector<16x64xf32>
    %246 = arith.truncf %245 : vector<16x64xf32> to vector<16x64xbf16>
    %c1_75 = arith.constant 1 : index
    %c0_76 = arith.constant 0 : index
    %c0_77 = arith.constant 0 : index
    %247 = vector.load %arg6[%c1_75, %c0_76, %c0_77] : memref<2x64x32xbf16, #tpu.memory_space<vmem>>, vector<1x64x32xbf16>
    %248 = vector.shape_cast %247 : vector<1x64x32xbf16> to vector<64x32xbf16>
    %cst_78 = arith.constant dense<0.000000e+00> : vector<16x32xf32>
    %249 = tpu.matmul %246, %248, %cst_78 {dimension_numbers = #tpu.dot_dimension_numbers<[1], [0], [0], [1], [0, 0, 1, 1], [], []>} : vector<16x64xbf16>, vector<64x32xbf16>, vector<16x32xf32> -> vector<16x32xf32>
    %250 = vector.broadcast %158 : vector<1x32xf32> to vector<16x32xf32>
    %251 = arith.addf %249, %250 : vector<16x32xf32>
    %252 = arith.addf %226, %251 : vector<16x32xf32>
    %cst_79 = arith.constant dense<0.000000e+00> : vector<16xf32>
    %253 = vector.multi_reduction <add>, %252, %cst_79 [1] : vector<16x32xf32> to vector<16xf32>
    %254 = vector.shape_cast %253 : vector<16xf32> to vector<16x1xf32>
    %cst_80 = arith.constant 3.200000e+01 : f32
    %255 = vector.broadcast %cst_80 : f32 to vector<16x1xf32>
    %256 = arith.divf %254, %255 : vector<16x1xf32>
    %257 = vector.broadcast %256 : vector<16x1xf32> to vector<16x32xf32>
    %258 = arith.subf %252, %257 : vector<16x32xf32>
    %259 = arith.mulf %258, %258 : vector<16x32xf32>
    %cst_81 = arith.constant dense<0.000000e+00> : vector<16xf32>
    %260 = vector.multi_reduction <add>, %259, %cst_81 [1] : vector<16x32xf32> to vector<16xf32>
    %261 = vector.shape_cast %260 : vector<16xf32> to vector<16x1xf32>
    %cst_82 = arith.constant 3.200000e+01 : f32
    %262 = vector.broadcast %cst_82 : f32 to vector<16x1xf32>
    %263 = arith.divf %261, %262 : vector<16x1xf32>
    %264 = vector.broadcast %256 : vector<16x1xf32> to vector<16x32xf32>
    %265 = arith.subf %252, %264 : vector<16x32xf32>
    %cst_83 = arith.constant 9.99999996E-13 : f32
    %266 = vector.broadcast %cst_83 : f32 to vector<16x1xf32>
    %267 = arith.addf %263, %266 : vector<16x1xf32>
    %268 = math.rsqrt %267 : vector<16x1xf32>
    %269 = vector.broadcast %268 : vector<16x1xf32> to vector<16x32xf32>
    %270 = arith.mulf %265, %269 : vector<16x32xf32>
    %271 = vector.broadcast %159 : vector<1x32xf32> to vector<16x32xf32>
    %272 = arith.mulf %270, %271 : vector<16x32xf32>
    %273 = vector.broadcast %160 : vector<1x32xf32> to vector<16x32xf32>
    %274 = arith.addf %272, %273 : vector<16x32xf32>
    %275 = vector.extract_strided_slice %0 {offsets = [2, 0], sizes = [1, 32], strides = [1, 1]} : vector<8x128xf32> to vector<1x32xf32>
    %276 = vector.extract_strided_slice %0 {offsets = [3, 0], sizes = [1, 32], strides = [1, 1]} : vector<8x128xf32> to vector<1x32xf32>
    %277 = vector.extract_strided_slice %0 {offsets = [4, 0], sizes = [1, 32], strides = [1, 1]} : vector<8x128xf32> to vector<1x32xf32>
    %278 = vector.extract_strided_slice %0 {offsets = [5, 0], sizes = [1, 128], strides = [1, 1]} : vector<8x128xf32> to vector<1x128xf32>
    %279 = arith.truncf %274 : vector<16x32xf32> to vector<16x32xbf16>
    %c0_84 = arith.constant 0 : index
    %c0_85 = arith.constant 0 : index
    %280 = vector.load %arg8[%c0_84, %c0_85] : memref<32x32xbf16, #tpu.memory_space<vmem>>, vector<32x32xbf16>
    %cst_86 = arith.constant dense<0.000000e+00> : vector<16x32xf32>
    %281 = tpu.matmul %279, %280, %cst_86 {dimension_numbers = #tpu.dot_dimension_numbers<[1], [0], [0], [1], [0, 0, 1, 1], [], []>} : vector<16x32xbf16>, vector<32x32xbf16>, vector<16x32xf32> -> vector<16x32xf32>
    %282 = vector.broadcast %275 : vector<1x32xf32> to vector<16x32xf32>
    %283 = arith.addf %281, %282 : vector<16x32xf32>
    %284 = arith.mulf %283, %283 : vector<16x32xf32>
    %285 = arith.mulf %283, %284 : vector<16x32xf32>
    %cst_87 = arith.constant 4.471500e-02 : f32
    %286 = vector.broadcast %cst_87 : f32 to vector<16x32xf32>
    %287 = arith.mulf %286, %285 : vector<16x32xf32>
    %288 = arith.addf %283, %287 : vector<16x32xf32>
    %cst_88 = arith.constant 0.797884583 : f32
    %289 = vector.broadcast %cst_88 : f32 to vector<16x32xf32>
    %290 = arith.mulf %289, %288 : vector<16x32xf32>
    %291 = math.tanh %290 : vector<16x32xf32>
    %cst_89 = arith.constant 1.000000e+00 : f32
    %292 = vector.broadcast %cst_89 : f32 to vector<16x32xf32>
    %293 = arith.addf %292, %291 : vector<16x32xf32>
    %cst_90 = arith.constant 5.000000e-01 : f32
    %294 = vector.broadcast %cst_90 : f32 to vector<16x32xf32>
    %295 = arith.mulf %294, %293 : vector<16x32xf32>
    %296 = arith.mulf %283, %295 : vector<16x32xf32>
    %cst_91 = arith.constant dense<0.000000e+00> : vector<16xf32>
    %297 = vector.multi_reduction <add>, %296, %cst_91 [1] : vector<16x32xf32> to vector<16xf32>
    %298 = vector.shape_cast %297 : vector<16xf32> to vector<16x1xf32>
    %cst_92 = arith.constant 3.200000e+01 : f32
    %299 = vector.broadcast %cst_92 : f32 to vector<16x1xf32>
    %300 = arith.divf %298, %299 : vector<16x1xf32>
    %301 = vector.broadcast %300 : vector<16x1xf32> to vector<16x32xf32>
    %302 = arith.subf %296, %301 : vector<16x32xf32>
    %303 = arith.mulf %302, %302 : vector<16x32xf32>
    %cst_93 = arith.constant dense<0.000000e+00> : vector<16xf32>
    %304 = vector.multi_reduction <add>, %303, %cst_93 [1] : vector<16x32xf32> to vector<16xf32>
    %305 = vector.shape_cast %304 : vector<16xf32> to vector<16x1xf32>
    %cst_94 = arith.constant 3.200000e+01 : f32
    %306 = vector.broadcast %cst_94 : f32 to vector<16x1xf32>
    %307 = arith.divf %305, %306 : vector<16x1xf32>
    %308 = vector.broadcast %300 : vector<16x1xf32> to vector<16x32xf32>
    %309 = arith.subf %296, %308 : vector<16x32xf32>
    %cst_95 = arith.constant 9.99999996E-13 : f32
    %310 = vector.broadcast %cst_95 : f32 to vector<16x1xf32>
    %311 = arith.addf %307, %310 : vector<16x1xf32>
    %312 = math.rsqrt %311 : vector<16x1xf32>
    %313 = vector.broadcast %312 : vector<16x1xf32> to vector<16x32xf32>
    %314 = arith.mulf %309, %313 : vector<16x32xf32>
    %315 = vector.broadcast %276 : vector<1x32xf32> to vector<16x32xf32>
    %316 = arith.mulf %314, %315 : vector<16x32xf32>
    %317 = vector.broadcast %277 : vector<1x32xf32> to vector<16x32xf32>
    %318 = arith.addf %316, %317 : vector<16x32xf32>
    %319 = arith.truncf %318 : vector<16x32xf32> to vector<16x32xbf16>
    %c0_96 = arith.constant 0 : index
    %c0_97 = arith.constant 0 : index
    %320 = vector.load %arg9[%c0_96, %c0_97] : memref<32x128xbf16, #tpu.memory_space<vmem>>, vector<32x128xbf16>
    %cst_98 = arith.constant dense<0.000000e+00> : vector<16x128xf32>
    %321 = tpu.matmul %319, %320, %cst_98 {dimension_numbers = #tpu.dot_dimension_numbers<[1], [0], [0], [1], [0, 0, 1, 1], [], []>} : vector<16x32xbf16>, vector<32x128xbf16>, vector<16x128xf32> -> vector<16x128xf32>
    %322 = vector.broadcast %278 : vector<1x128xf32> to vector<16x128xf32>
    %323 = arith.addf %321, %322 : vector<16x128xf32>
    %324 = vector.shape_cast %323 : vector<16x128xf32> to vector<2x8x128xf32>
    %cst_99 = arith.constant dense<0xFF800000> : vector<2x128xf32>
    %325 = vector.multi_reduction <maximumf>, %324, %cst_99 [1] : vector<2x8x128xf32> to vector<2x128xf32>
    %326 = vector.shape_cast %325 : vector<2x128xf32> to vector<2x1x128xf32>
    %327 = vector.broadcast %326 : vector<2x1x128xf32> to vector<2x8x128xf32>
    %328 = arith.subf %324, %327 : vector<2x8x128xf32>
    %329 = math.exp %328 : vector<2x8x128xf32>
    %cst_100 = arith.constant dense<0.000000e+00> : vector<2x128xf32>
    %330 = vector.multi_reduction <add>, %329, %cst_100 [1] : vector<2x8x128xf32> to vector<2x128xf32>
    %331 = vector.shape_cast %330 : vector<2x128xf32> to vector<2x1x128xf32>
    %332 = vector.broadcast %331 : vector<2x1x128xf32> to vector<2x8x128xf32>
    %333 = arith.divf %329, %332 : vector<2x8x128xf32>
    %c0_101 = arith.constant 0 : index
    %c0_102 = arith.constant 0 : index
    %c0_103 = arith.constant 0 : index
    %334 = vector.load %arg10[%c0_101, %c0_102, %c0_103] : memref<2x8x128xf32, #tpu.memory_space<vmem>>, vector<2x8x128xf32>
    tpu.vector_store %arg10[%c0_101, %c0_102, %c0_103], %333 {strides = array<i32>} : memref<2x8x128xf32, #tpu.memory_space<vmem>>, vector<2x8x128xf32>,
    return
  }
}

</mosaic_0001>

<bundles_post_ra>
// kernel: tile.8
= control target key start
LH: loop header
LB: loop body
LE: loop exit
PB: predicated region body
PF: predicated region fallthrough
CT: control target
= control target key end

     0   :  { %v13_v2 = vmov 0   ;;  %s30_s0 = inlined_call_operand.vmem [shape: pred[16], index: 0, kind: input, shape index: {}]   ;;  %s31_s1 = inlined_call_operand.vmem [shape: pred[2,16], index: 1, kind: output, shape index: {}]  }
   0x1   :  { %v4_v0 = vld [vmem:[%s30_s0] ss:$0 sm:$0xff] }
   0x2   :  { %v7_v1 = vand.u32 255, %v4_v0 }
   0x4   :  { %v8_v3 = vpack.c.b16 %v13_v2, %v7_v1 }
   0x6   :  { %v9_v4 = vpack.c.b8 %v13_v2, %v8_v3 }
   0x8   :  { %11 = vst [vmem:[%s31_s1] sm:$0x1] %v9_v4 }

// kernel: _automl_forward_impl.1
= control target key start
LH: loop header
LB: loop body
LE: loop exit
PB: predicated region body
PF: predicated region fallthrough
CT: control target
= control target key end

     0   :  { %vm40_vm0 = vcmask 261120   ;;  %s2284_s0 = inlined_call_operand.vmem [shape: f32[16,32], index: 0, kind: input, shape index: {}]   ;;  %s2285_s1 = inlined_call_operand.vmem [shape: f32[32,32], index: 1, kind: input, shape index: {}]   ;;  %s2286_s2 = inlined_call_operand.vmem [shape: f32[8,128], index: 2, kind: input, shape index: {}]   ;;  %s2287_s3 = inlined_call_operand.vmem [shape: bf16[2,32,96], index: 3, kind: input, shape index: {}]   ;;  %s2288_s4 = inlined_call_operand.vmem [shape: bf16[2,32,32], index: 4, kind: input, shape index: {}]   ;;  %s2289_s5 = inlined_call_operand.vmem [shape: bf16[2,32,64], index: 5, kind: input, shape index: {}]   ;;  %s2290_s6 = inlined_call_operand.vmem [shape: bf16[2,64,32], index: 6, kind: input, shape index: {}]   ;;  %s2291_s7 = inlined_call_operand.vmem [shape: f32[2,8,128], index: 7, kind: input, shape index: {}]   ;;  %s2292_s8 = inlined_call_operand.vmem [shape: bf16[32,32], index: 8, kind: input, shape index: {}]   ;;  %s2293_s9 = inlined_call_operand.vmem [shape: bf16[32,128], index: 9, kind: input, shape index: {}]   ;;  %s2294_s10 = inlined_call_operand.hbm [shape: f32[2,8,128], index: 10, kind: output, shape index: {}]  }
   0x1   :  { %v38_v0 = vld [vmem:[%s2284_s0] sm:$0xff]  ;;  %v39_v1 = vld [vmem:[%s2284_s0 + $0x8] sm:$0xff] }
   0x2   :  { %v41_v2 = vsel %vm40_vm0, %v38_v0, 0.0  ;;  %v44_v3 = vsel %vm40_vm0, %v39_v1, 0.0 }
   0x3   :  { %42 = vadd.xlane.f32.xlu0 %v41_v2 }
   0x7   :  { %45 = vadd.xlane.f32.xlu0 %v44_v3 }
   0x8   :  { %15 = vsyncpa [#allocation3], 0  ;;  %v1735_v14 = vld [vmem:[%s2287_s3] sm:$0xff]   ;;  %v1860_v15 = vmov 0.0   ;;  %v1736_v16 = vld [vmem:[%s2287_s3 + $0x8] sm:$0xff]   ;;  %vm1861_vm1 = vmmov 0   ;;  %v68_v21 = vlaneseq }
   0x9   :  { %1592 = vmatprep.subr.bf16.mxu0 %v1860_v15  ;;  %1596 = vmatprep.mubr.msk.bf16.mxu0 %vm1861_vm1, %v1860_v15  ;;  %v37_v26 = vld [vmem:[%s2286_s2] sm:$0xff]  ;;  %s1862_s24 = smov 112   ;;  %vm172_vm2 = vcmask 130048   ;;  %s1863_s25 = smov 96   ;;  %v1998_v63 = vld [vmem:[%s2285_s1 + $0x10] sm:$0xff]  ;;  %vm576_vm3 = vcmask 523264  }
   0xa   :  { %1593 = vmatpush3.bf16.msra.mxu0 %v1735_v14  ;;  %v1944_v24 = vshrl.u32 %v68_v21, 7  ;;  %v1967_v39 = vld [vmem:[%s2291_s7] sm:$0xff]  ;;  %s1865_s17 = smov 16  }
   0xb   :  { %1594 = vmatprep.subr.bf16.mxu0 %v1860_v15  ;;  %v1993_v61 = vld [vmem:[%s2285_s1] sm:$0xff] }
   0xc   :  { %v1947_v25 = vsub.s32 0, %v1944_v24  ;;  %v1954_v30 = vsub.s32 1, %v1944_v24 }
   0xe   :  { %1595 = vmatpush3.bf16.msra.mxu0 %v1736_v16  ;;  %v71_v29 = vrot.slane %v37_v26, %v1947_v25  ;;  %v77_v34 = vrot.slane %v37_v26, %v1954_v30  ;;  %v93_v40 = vrot.slane %v1967_v39, %v1947_v25 }
  0x90   :  { %v43_v4 = vpop.xlane.xlu0 %42 }
  0x91   :  { %v48_v5 = vmul.f32 0.03125, %v43_v4 }
  0x93   :  { %v50_v6 = vsub.f32 %v38_v0, %v48_v5 }
  0x94   :  { %v46_v7 = vpop.xlane.xlu0 %45 }
  0x95   :  { %v49_v8 = vmul.f32 0.03125, %v46_v7  ;;  %v52_v9 = vmul.f32 %v50_v6, %v50_v6 }
  0x97   :  { %v51_v10 = vsub.f32 %v39_v1, %v49_v8  ;;  %v54_v11 = vsel %vm40_vm0, %v52_v9, 0.0  ;;  %v2003_v1 = vld [vmem:[%s2285_s1 + $0x8] sm:$0xff]  ;;  %v2012_v8 = vld [vmem:[%s2285_s1 + $0x18] sm:$0xff]  ;;  %s1864_s1 = smov 64  }
  0x98   :  { %55 = vadd.xlane.f32.xlu1 %v54_v11 }
  0x99   :  { %v53_v12 = vmul.f32 %v51_v10, %v51_v10 }
  0x9b   :  { %v57_v13 = vsel %vm40_vm0, %v53_v12, 0.0 }
  0x9c   :  { %58 = vadd.xlane.f32.xlu1 %v57_v13 }
 0x125   :  { %v56_v17 = vpop.xlane.xlu1 %55 }
 0x126   :  { %v60_v18 = vmul.f32 0.03125, %v56_v17 }
 0x128   :  { %v62_v19 = vadd.f32 1e-12, %v60_v18 }
 0x129   :  { %v59_v20 = vpop.xlane.xlu1 %58 }
 0x12a   :  { %1759 = vrsqrt.f32 %v62_v19  ;;  %v61_v22 = vmul.f32 0.03125, %v59_v20 }
 0x12c   :  { %v63_v23 = vadd.f32 1e-12, %v61_v22 }
 0x12e   :  { %1761 = vrsqrt.f32 %v63_v23 }
 0x134   :  { %v1760_v27 = vpop.eup %1759 }
 0x135   :  { %v66_v28 = vmul.f32 %v1760_v27, %v50_v6 }
 0x137   :  { %v72_v33 = vmul.f32 %v71_v29, %v66_v28 }
 0x138   :  { %v1762_v31 = vpop.eup %1761 }
 0x139   :  { %v67_v32 = vmul.f32 %v1762_v31, %v51_v10  ;;  %v1957_v36 = vadd.f32 %v77_v34, %v72_v33 }
 0x13b   :  { %v73_v35 = vmul.f32 %v71_v29, %v67_v32 }
 0x13d   :  { %v1959_v37 = vadd.f32 %v77_v34, %v73_v35 }
 0x13f   :  { %v85_v38 = vpack.c.bf16 %v1959_v37, %v1957_v36 }
 0x141   :  { %1597 = vmatmul.mubr.msk.bf16.vlgmr.msra.gmra.mrb[0].mxu0 %vm40_vm0, %v85_v38 }
 0x214   :  { %v143_v41 = vpop.f32.mrb[0].mxu0 }
 0x215   :  { %v144_v42 = vadd.f32 %v143_v41, %v93_v40  ;;  %v1598_v43 = vpop.f32.mrb[1].mxu0 }
 0x216   :  { %v146_v44 = vpop.f32.mrb[2].mxu0 }
 0x217   :  { %v147_v45 = vadd.f32 %v146_v44, %v93_v40  ;;  %152 = vrot.lane.b32.xlu0 %v144_v42, %s1862_s24  ;;  %v1599_v46 = vpop.f32.mrb[3].mxu0  ;;  %v158_v48 = vmul.f32 0.25, %v144_v42 }
 0x219   :  { %154 = vrot.lane.b32.xlu1 %v147_v45, %s1862_s24  ;;  %v1973_v47 = vpack.c.bf16 %v147_v45, %v144_v42  ;;  %v159_v49 = vmul.f32 0.25, %v147_v45 }
 0x21b   :  { %v162_v50 = vpack.c.bf16 %v159_v49, %v158_v48 }
 0x21d   :  { %168 = vrot.lane.b32.xlu1 %v1973_v47, %s1863_s25  ;;  %1604 = vmatprep.mubr.msk.bf16.mxu1 %vm172_vm2, %v162_v50 }
 0x289   :  { %v153_v51 = vpop.permute.xlu0 %152 }
 0x28a   :  { %v160_v59 = vmul.f32 0.25, %v153_v51 }
 0x28b   :  { %v155_v52 = vpop.permute.xlu1 %154 }
 0x28c   :  { %v1978_v53 = vpack.c.bf16 %v155_v52, %v153_v51  ;;  %v161_v58 = vmul.f32 0.25, %v155_v52 }
 0x28e   :  { %170 = vrot.lane.b32.xlu1 %v1978_v53, %s1863_s25  ;;  %v163_v60 = vpack.c.bf16 %v161_v58, %v160_v59 }
 0x28f   :  { %v169_v54 = vpop.permute.xlu1 %168 }
 0x290   :  { %1712 = vmatprep.subr.msk.bf16.mxu1 %vm172_vm2, %v169_v54  ;;  %v180_v55 = vsel %vm172_vm2, %v169_v54, 0 }
 0x291   :  { %1601 = vmatpush3.bf16.xpose.msra.mxu1 %v180_v55 }
 0x300   :  { %v171_v56 = vpop.permute.xlu1 %170 }
 0x301   :  { %1713 = vmatprep.subr.msk.bf16.mxu1 %vm172_vm2, %v171_v56  ;;  %v183_v57 = vsel %vm172_vm2, %v171_v56, 0  ;;  %v1737_v56 = vld [vmem:[%s2288_s4] sm:$0xff]  }
 0x302   :  { %1603 = vmatpush3.bf16.xpose.msra.mxu1 %v183_v57  ;;  %v1738_v57 = vld [vmem:[%s2288_s4 + $0x8] sm:$0xff]  }
 0x303   :  { %1624 = vmatprep.subr.bf16.mxu1 %v1860_v15 }
 0x309   :  { %1605 = vmatmul.mubr.msk.bf16.vlgmr.msra.gmra.mrb[0].mxu1 %vm172_vm2, %v163_v60 }
 0x30a   :  { %1628 = vmatprep.mubr.msk.bf16.mxu1 %vm1861_vm1, %v1860_v15 }
 0x3dc   :  { %v1606_v62 = vpop.f32.mrb[0].mxu1 }
 0x3dd   :  { %v219_v0 = vpop.f32.mrb[1].mxu1  ;;  %v228_v5 = vadd.f32 %v1606_v62, %v1998_v63 }
 0x3de   :  { %v220_v2 = vadd.f32 %v219_v0, %v1993_v61  ;;  %v1607_v3 = vpop.f32.mrb[2].mxu1 }
 0x3df   :  { %v222_v4 = vpop.f32.mrb[3].mxu1  ;;  %v231_v10 = vadd.f32 %v1607_v3, %v2012_v8  ;;  %v240_v11 = vsel %vm40_vm0, %v228_v5, -inf }
 0x3e0   :  { %v223_v6 = vadd.f32 %v222_v4, %v2003_v1  ;;  %v234_v7 = vsel %vm40_vm0, %v220_v2, -inf }
 0x3e1   :  { %235 = vmax.xlane.f32.xlu0 %v234_v7  ;;  %v243_v12 = vsel %vm40_vm0, %v231_v10, -inf }
 0x3e2   :  { %v237_v9 = vsel %vm40_vm0, %v223_v6, -inf }
 0x3e3   :  { %238 = vmax.xlane.f32.xlu1 %v237_v9  ;;  %v359_v9 = vrot.slane %v1967_v39, %v1954_v30 }
 0x3e5   :  { %241 = vmax.xlane.f32.xlu0 %v240_v11 }
 0x3e9   :  { %244 = vmax.xlane.f32.xlu0 %v243_v12 }
 0x46e   :  { %v236_v13 = vpop.xlane.xlu0 %235 }
 0x46f   :  { %v246_v14 = vsub.f32 %v220_v2, %v236_v13 }
 0x470   :  { %v239_v16 = vpop.xlane.xlu1 %238 }
 0x471   :  { %v250_v19 = vmul.f32 1.442695, %v246_v14  ;;  %v247_v20 = vsub.f32 %v223_v6, %v239_v16 }
 0x472   :  { %v242_v17 = vpop.xlane.xlu0 %241 }
 0x473   :  { %v248_v18 = vsub.f32 %v228_v5, %v242_v17  ;;  %v252_v26 = vmul.f32 1.442695, %v247_v20 }
 0x475   :  { %v254_v21 = vmul.f32 1.442695, %v248_v18 }
 0x476   :  { %v245_v22 = vpop.xlane.xlu0 %244 }
 0x477   :  { %1763 = vpow2.f32 %v254_v21  ;;  %v249_v23 = vsub.f32 %v231_v10, %v245_v22 }
 0x478   :  { %1765 = vpow2.f32 %v250_v19 }
 0x479   :  { %v256_v27 = vmul.f32 1.442695, %v249_v23 }
 0x47b   :  { %1767 = vpow2.f32 %v256_v27 }
 0x47c   :  { %1769 = vpow2.f32 %v252_v26 }
 0x481   :  { %v1764_v28 = vpop.eup %1763 }
 0x482   :  { %v264_v29 = vsel %vm40_vm0, %v1764_v28, 0.0  ;;  %v1766_v31 = vpop.eup %1765 }
 0x483   :  { %265 = vadd.xlane.f32.xlu0 %v264_v29  ;;  %v258_v33 = vsel %vm40_vm0, %v1766_v31, 0.0 }
 0x485   :  { %v1768_v32 = vpop.eup %1767 }
 0x486   :  { %v267_v34 = vsel %vm40_vm0, %v1768_v32, 0.0  ;;  %v1770_v35 = vpop.eup %1769 }
 0x487   :  { %259 = vadd.xlane.f32.xlu0 %v258_v33  ;;  %268 = vadd.xlane.f32.xlu1 %v267_v34  ;;  %v261_v38 = vsel %vm40_vm0, %v1770_v35, 0.0  ;;  %v1740_v33 = vld [vmem:[%s2289_s5 + $0x8] sm:$0xff]  }
 0x48b   :  { %262 = vadd.xlane.f32.xlu1 %v261_v38 }
 0x49c   :  { %282 = vrot.lane.b32.xlu1 %v1978_v53, %s1864_s1 }
 0x49d   :  { %280 = vrot.lane.b32.xlu0 %v1973_v47, %s1864_s1 }
 0x510   :  { %v266_v40 = vpop.xlane.xlu0 %265 }
 0x514   :  { %v269_v41 = vpop.xlane.xlu1 %268  ;;  %v260_v42 = vpop.xlane.xlu0 %259 }
 0x515   :  { %1771 = vrcp.f32 %v269_v41 }
 0x516   :  { %1773 = vrcp.f32 %v260_v42 }
 0x517   :  { %1775 = vrcp.f32 %v266_v40 }
 0x518   :  { %v263_v43 = vpop.xlane.xlu1 %262  ;;  %v281_v44 = vpop.permute.xlu0 %280 }
 0x519   :  { %1777 = vrcp.f32 %v263_v43  ;;  %1608 = vmatprep.subr.bf16.mxu0 %v281_v44  ;;  %v2062_v43 = vsub.s32 2, %v1944_v24 }
 0x51a   :  { %1609 = vmatpush3.bf16.msra.mxu0 %v281_v44 }
 0x51c   :  { %v283_v45 = vpop.permute.xlu1 %282 }
 0x51d   :  { %1610 = vmatprep.subr.bf16.mxu0 %v283_v45 }
 0x51e   :  { %1611 = vmatpush3.bf16.msra.mxu0 %v283_v45  ;;  %v447_v45 = vrot.slane %v1967_v39, %v2062_v43 }
 0x51f   :  { %1616 = vmatprep.subr.bf16.mxu0 %v1860_v15  ;;  %v1772_v46 = vpop.eup %1771 }
 0x520   :  { %v1774_v48 = vpop.eup %1773  ;;  %v277_v50 = vmul.f32 %v1772_v46, %v1768_v32 }
 0x521   :  { %v1776_v49 = vpop.eup %1775  ;;  %v274_v51 = vmul.f32 %v1774_v48, %v1766_v31  ;;  %v2067_v48 = vsub.s32 3, %v1944_v24 }
 0x522   :  { %v276_v53 = vmul.f32 %v1776_v49, %v1764_v28 }
 0x523   :  { %v1778_v47 = vpop.eup %1777 }
 0x524   :  { %v275_v52 = vmul.f32 %v1778_v47, %v1770_v35  ;;  %v279_v55 = vpack.c.bf16 %v277_v50, %v276_v53 }
 0x526   :  { %v278_v54 = vpack.c.bf16 %v275_v52, %v274_v51  ;;  %v453_v51 = vrot.slane %v1967_v39, %v2067_v48 }
 0x528   :  { %1612 = vmatprep.mubr.msk.bf16.mxu0 %vm40_vm0, %v278_v54 }
 0x529   :  { %1613 = vmatmul.mubr.msk.bf16.vlgmr.msra.gmra.mrb[4].mxu0 %vm40_vm0, %v279_v55 }
 0x52a   :  { %1620 = vmatprep.mubr.msk.bf16.mxu0 %vm1861_vm1, %v1860_v15  ;;  %1617 = vmatpush3.bf16.msra.mxu0 %v1737_v56  ;;  %v1741_v56 = vld [vmem:[%s2290_s6] sm:$0xff]  }
 0x52b   :  { %1618 = vmatprep.subr.bf16.mxu0 %v1860_v15 }
 0x52e   :  { %1619 = vmatpush3.bf16.msra.mxu0 %v1738_v57  ;;  %v1742_v57 = vld [vmem:[%s2290_s6 + $0x8] sm:$0xff]  }
 0x52f   :  { %1632 = vmatprep.subr.bf16.mxu0 %v1860_v15 }
 0x5fc   :  { %v1614_v58 = vpop.f32.mrb[4].mxu0 }
 0x5fd   :  { %v326_v59 = vpop.f32.mrb[5].mxu0 }
 0x5fe   :  { %v1615_v60 = vpop.f32.mrb[6].mxu0 }
 0x5ff   :  { %v1725_v62 = vpack.i.bf16 %v1615_v60, %v1614_v58  ;;  %v329_v0 = vpop.f32.mrb[7].mxu0  ;;  %v1743_v58 = vld [vmem:[%s2290_s6 + $0x10] sm:$0xff]   ;;  %v2090_v60 = vsub.s32 4, %v1944_v24 }
 0x601   :  { %1726 = vrot.lane.b32.xlu1 %v1725_v62, %s1865_s17  ;;  %v464_v62 = vrot.slane %v1967_v39, %v2090_v60 }
 0x673   :  { %v1727_v2 = vpop.permute.xlu1 %1726 }
 0x674   :  { %v1729_v3 = vunpack.i.h.bf16 %v1727_v2  ;;  %v1728_v4 = vunpack.i.l.bf16 %v1727_v2 }
 0x676   :  { %v349_v5 = vsel %vm172_vm2, %v326_v59, %v1728_v4  ;;  %v350_v6 = vsel %vm172_vm2, %v329_v0, %v1729_v3  ;;  %v1744_v59 = vld [vmem:[%s2290_s6 + $0x18] sm:$0xff]  }
 0x677   :  { %v351_v7 = vpack.c.bf16 %v350_v6, %v349_v5 }
 0x679   :  { %1621 = vmatmul.mubr.msk.bf16.vlgmr.msra.gmra.mrb[8].mxu0 %vm40_vm0, %v351_v7 }
 0x67a   :  { %1640 = vmatprep.mubr.msk.bf16.mxu0 %vm1861_vm1, %v1860_v15  ;;  %1633 = vmatpush3.bf16.msra.mxu0 %v1741_v56 }
 0x67b   :  { %1634 = vmatprep.subr.bf16.mxu0 %v1860_v15 }
 0x67e   :  { %1635 = vmatpush3.bf16.msra.mxu0 %v1742_v57  ;;  %v1746_v57 = vld [vmem:[%s2287_s3 + $0x18] sm:$0xff]  }
 0x67f   :  { %1636 = vmatprep.subr.bf16.mxu0 %v1860_v15 }
 0x682   :  { %1637 = vmatpush3.bf16.msra.mxu0 %v1743_v58 }
 0x683   :  { %1638 = vmatprep.subr.bf16.mxu0 %v1860_v15 }
 0x686   :  { %1639 = vmatpush3.bf16.msra.mxu0 %v1744_v59 }
 0x74c   :  { %v409_v10 = vpop.f32.mrb[8].mxu0 }
 0x74d   :  { %v410_v11 = vadd.f32 %v409_v10, %v359_v9  ;;  %v1622_v12 = vpop.f32.mrb[9].mxu0 }
 0x74e   :  { %v412_v13 = vpop.f32.mrb[10].mxu0 }
 0x74f   :  { %v413_v14 = vadd.f32 %v412_v13, %v359_v9  ;;  %v1623_v16 = vpop.f32.mrb[11].mxu0  ;;  %v416_v17 = vadd.f32 %v410_v11, %v1957_v36 }
 0x751   :  { %v418_v18 = vsel %vm40_vm0, %v416_v17, 0.0  ;;  %v417_v19 = vadd.f32 %v413_v14, %v1959_v37  ;;  %v1739_v37 = vld [vmem:[%s2289_s5] sm:$0xff]  }
 0x752   :  { %419 = vadd.xlane.f32.xlu1 %v418_v18  ;;  %1625 = vmatpush3.bf16.msra.mxu1 %v1739_v37 }
 0x753   :  { %v421_v20 = vsel %vm40_vm0, %v417_v19, 0.0  ;;  %1626 = vmatprep.subr.bf16.mxu1 %v1860_v15 }
 0x754   :  { %422 = vadd.xlane.f32.xlu0 %v421_v20 }
 0x756   :  { %1627 = vmatpush3.bf16.msra.mxu1 %v1740_v33 }
 0x757   :  { %1644 = vmatprep.subr.bf16.mxu1 %v1860_v15 }
 0x7df   :  { %v420_v21 = vpop.xlane.xlu1 %419 }
 0x7e0   :  { %v424_v22 = vmul.f32 0.03125, %v420_v21 }
 0x7e1   :  { %v423_v23 = vpop.xlane.xlu0 %422 }
 0x7e2   :  { %v426_v26 = vsub.f32 %v416_v17, %v424_v22  ;;  %v425_v27 = vmul.f32 0.03125, %v423_v23 }
 0x7e4   :  { %v427_v28 = vsub.f32 %v417_v19, %v425_v27  ;;  %v428_v29 = vmul.f32 %v426_v26, %v426_v26 }
 0x7e6   :  { %v430_v31 = vsel %vm40_vm0, %v428_v29, 0.0  ;;  %v429_v32 = vmul.f32 %v427_v28, %v427_v28 }
 0x7e7   :  { %431 = vadd.xlane.f32.xlu0 %v430_v31  ;;  %v2096_v31 = vsub.s32 5, %v1944_v24 }
 0x7e8   :  { %v433_v36 = vsel %vm40_vm0, %v429_v32, 0.0 }
 0x7e9   :  { %v551_v32 = vrot.slane %v1967_v39, %v2096_v31 }
 0x7eb   :  { %434 = vadd.xlane.f32.xlu0 %v433_v36 }
 0x874   :  { %v432_v34 = vpop.xlane.xlu0 %431 }
 0x875   :  { %v436_v35 = vmul.f32 0.03125, %v432_v34 }
 0x877   :  { %v438_v38 = vadd.f32 1e-12, %v436_v35 }
 0x878   :  { %v435_v40 = vpop.xlane.xlu0 %434 }
 0x879   :  { %1779 = vrsqrt.f32 %v438_v38  ;;  %v437_v41 = vmul.f32 0.03125, %v435_v40 }
 0x87b   :  { %v439_v42 = vadd.f32 1e-12, %v437_v41 }
 0x87d   :  { %1781 = vrsqrt.f32 %v439_v42 }
 0x883   :  { %v1780_v44 = vpop.eup %1779 }
 0x884   :  { %v442_v46 = vmul.f32 %v1780_v44, %v426_v26 }
 0x886   :  { %v448_v47 = vmul.f32 %v447_v45, %v442_v46 }
 0x887   :  { %v1782_v49 = vpop.eup %1781 }
 0x888   :  { %v443_v50 = vmul.f32 %v1782_v49, %v427_v28  ;;  %v454_v53 = vadd.f32 %v453_v51, %v448_v47 }
 0x88a   :  { %v449_v52 = vmul.f32 %v447_v45, %v443_v50 }
 0x88c   :  { %v455_v54 = vadd.f32 %v453_v51, %v449_v52 }
 0x88e   :  { %v456_v55 = vpack.c.bf16 %v455_v54, %v454_v53 }
 0x890   :  { %1629 = vmatmul.mubr.msk.bf16.vlgmr.msra.gmra.mrb[4].mxu1 %vm40_vm0, %v456_v55 }
 0x891   :  { %1648 = vmatprep.mubr.msk.bf16.mxu1 %vm1861_vm1, %v1860_v15 }
 0x963   :  { %v514_v0 = vpop.f32.mrb[4].mxu1 }
 0x964   :  { %v515_v2 = vadd.f32 %v514_v0, %v464_v62  ;;  %v1630_v3 = vpop.f32.mrb[5].mxu1 }
 0x965   :  { %v517_v4 = vpop.f32.mrb[6].mxu1 }
 0x966   :  { %v521_v5 = vmul.f32 %v515_v2, %v515_v2  ;;  %v518_v6 = vadd.f32 %v517_v4, %v464_v62  ;;  %v1631_v7 = vpop.f32.mrb[7].mxu1  ;;  %v651_v4 = vsub.s32 6, %v1944_v24 }
 0x968   :  { %v523_v9 = vmul.f32 %v521_v5, %v515_v2  ;;  %v522_v10 = vmul.f32 %v518_v6, %v518_v6  ;;  %v652_v5 = vrot.slane %v1967_v39, %v651_v4 }
 0x96a   :  { %v525_v11 = vmul.f32 0.044715, %v523_v9  ;;  %v524_v12 = vmul.f32 %v522_v10, %v518_v6 }
 0x96c   :  { %v527_v13 = vadd.f32 %v525_v11, %v515_v2  ;;  %v526_v14 = vmul.f32 0.044715, %v524_v12 }
 0x96e   :  { %v529_v16 = vmul.f32 0.7978846, %v527_v13  ;;  %v528_v17 = vadd.f32 %v526_v14, %v518_v6 }
 0x970   :  { %1783 = vtanh.f32 %v529_v16  ;;  %v530_v18 = vmul.f32 0.7978846, %v528_v17 }
 0x972   :  { %1785 = vtanh.f32 %v530_v18 }
 0x97a   :  { %v1784_v19 = vpop.eup %1783 }
 0x97b   :  { %v533_v20 = vadd.f32 1.0, %v1784_v19  ;;  %v2129_v19 = vld [vmem:[%s2291_s7 + $0x8] sm:$0xff] }
 0x97c   :  { %v1786_v21 = vpop.eup %1785 }
 0x97d   :  { %v535_v22 = vmul.f32 0.5, %v533_v20  ;;  %v534_v23 = vadd.f32 1.0, %v1786_v21  ;;  %v672_v20 = vrot.slane %v2129_v19, %v1947_v25 }
 0x97f   :  { %v536_v26 = vmul.f32 0.5, %v534_v23  ;;  %v537_v27 = vmul.f32 %v535_v22, %v515_v2 }
 0x981   :  { %v538_v28 = vmul.f32 %v536_v26, %v518_v6  ;;  %v657_v6 = vsub.s32 7, %v1944_v24 }
 0x983   :  { %v539_v29 = vpack.c.bf16 %v538_v28, %v537_v27  ;;  %v658_v13 = vrot.slane %v1967_v39, %v657_v6 }
 0x985   :  { %1641 = vmatmul.mubr.msk.bf16.vlgmr.msra.gmra.mrb[12].mxu0 %vm576_vm3, %v539_v29 }
 0xa58   :  { %v614_v36 = vpop.f32.mrb[12].mxu0 }
 0xa59   :  { %v615_v37 = vadd.f32 %v614_v36, %v551_v32  ;;  %v1642_v33 = vpop.f32.mrb[13].mxu0 }
 0xa5a   :  { %v617_v34 = vpop.f32.mrb[14].mxu0 }
 0xa5b   :  { %v618_v35 = vadd.f32 %v617_v34, %v551_v32  ;;  %v1643_v38 = vpop.f32.mrb[15].mxu0  ;;  %v621_v40 = vadd.f32 %v615_v37, %v454_v53 }
 0xa5d   :  { %v623_v41 = vsel %vm40_vm0, %v621_v40, 0.0  ;;  %v622_v42 = vadd.f32 %v618_v35, %v455_v54  ;;  %v1745_v54 = vld [vmem:[%s2287_s3 + $0x10] sm:$0xff]  }
 0xa5e   :  { %624 = vadd.xlane.f32.xlu1 %v623_v41  ;;  %1645 = vmatpush3.bf16.msra.mxu1 %v1745_v54 }
 0xa5f   :  { %v626_v44 = vsel %vm40_vm0, %v622_v42, 0.0  ;;  %1646 = vmatprep.subr.bf16.mxu1 %v1860_v15 }
 0xa60   :  { %627 = vadd.xlane.f32.xlu0 %v626_v44 }
 0xa62   :  { %1647 = vmatpush3.bf16.msra.mxu1 %v1746_v57 }
 0xaeb   :  { %v625_v45 = vpop.xlane.xlu1 %624 }
 0xaec   :  { %v629_v46 = vmul.f32 0.03125, %v625_v45 }
 0xaed   :  { %v628_v49 = vpop.xlane.xlu0 %627 }
 0xaee   :  { %v631_v47 = vsub.f32 %v621_v40, %v629_v46  ;;  %v630_v50 = vmul.f32 0.03125, %v628_v49 }
 0xaf0   :  { %v632_v51 = vsub.f32 %v622_v42, %v630_v50  ;;  %v633_v52 = vmul.f32 %v631_v47, %v631_v47 }
 0xaf2   :  { %v635_v55 = vsel %vm40_vm0, %v633_v52, 0.0  ;;  %v634_v56 = vmul.f32 %v632_v51, %v632_v51 }
 0xaf3   :  { %636 = vadd.xlane.f32.xlu1 %v635_v55 }
 0xaf4   :  { %v638_v53 = vsel %vm40_vm0, %v634_v56, 0.0 }
 0xaf5   :  { %639 = vadd.xlane.f32.xlu0 %v638_v53 }
 0xb80   :  { %v637_v58 = vpop.xlane.xlu1 %636 }
 0xb81   :  { %v641_v59 = vmul.f32 0.03125, %v637_v58 }
 0xb82   :  { %v640_v62 = vpop.xlane.xlu0 %639 }
 0xb83   :  { %v643_v0 = vadd.f32 1e-12, %v641_v59  ;;  %v642_v2 = vmul.f32 0.03125, %v640_v62 }
 0xb85   :  { %1787 = vrsqrt.f32 %v643_v0  ;;  %v644_v3 = vadd.f32 1e-12, %v642_v2 }
 0xb87   :  { %1789 = vrsqrt.f32 %v644_v3 }
 0xb8f   :  { %v1788_v7 = vpop.eup %1787 }
 0xb90   :  { %v647_v9 = vmul.f32 %v1788_v7, %v631_v47 }
 0xb91   :  { %v1790_v10 = vpop.eup %1789 }
 0xb92   :  { %v653_v11 = vmul.f32 %v652_v5, %v647_v9  ;;  %v648_v12 = vmul.f32 %v1790_v10, %v632_v51 }
 0xb94   :  { %v654_v14 = vmul.f32 %v652_v5, %v648_v12  ;;  %v2119_v16 = vadd.f32 %v658_v13, %v653_v11 }
 0xb96   :  { %v2121_v17 = vadd.f32 %v658_v13, %v654_v14 }
 0xb98   :  { %v663_v18 = vpack.c.bf16 %v2121_v17, %v2119_v16 }
 0xb9a   :  { %1649 = vmatmul.mubr.msk.bf16.vlgmr.msra.gmra.mrb[8].mxu1 %vm40_vm0, %v663_v18 }
 0xc6d   :  { %v722_v21 = vpop.f32.mrb[8].mxu1 }
 0xc6e   :  { %v723_v39 = vadd.f32 %v722_v21, %v672_v20  ;;  %v1650_v22 = vpop.f32.mrb[9].mxu1 }
 0xc6f   :  { %v725_v23 = vpop.f32.mrb[10].mxu1 }
 0xc70   :  { %v726_v26 = vadd.f32 %v725_v23, %v672_v20  ;;  %731 = vrot.lane.b32.xlu1 %v723_v39, %s1862_s24  ;;  %v1651_v27 = vpop.f32.mrb[11].mxu1  ;;  %v737_v28 = vmul.f32 0.25, %v723_v39 }
 0xc72   :  { %v738_v29 = vmul.f32 0.25, %v726_v26  ;;  %733 = vrot.lane.b32.xlu0 %v726_v26, %s1862_s24  ;;  %v2135_v32 = vpack.c.bf16 %v726_v26, %v723_v39 }
 0xc74   :  { %v741_v36 = vpack.c.bf16 %v738_v29, %v737_v28  ;;  %747 = vrot.lane.b32.xlu1 %v2135_v32, %s1863_s25 }
 0xc76   :  { %1656 = vmatprep.mubr.msk.bf16.mxu1 %vm172_vm2, %v741_v36 }
 0xce2   :  { %v732_v25 = vpop.permute.xlu1 %731 }
 0xce3   :  { %v739_v42 = vmul.f32 0.25, %v732_v25 }
 0xce4   :  { %v734_v37 = vpop.permute.xlu0 %733 }
 0xce5   :  { %v744_v33 = vpack.c.bf16 %v734_v37, %v732_v25  ;;  %v740_v41 = vmul.f32 0.25, %v734_v37 }
 0xce6   :  { %v748_v34 = vpop.permute.xlu1 %747 }
 0xce7   :  { %v758_v35 = vsel %vm172_vm2, %v748_v34, 0  ;;  %749 = vrot.lane.b32.xlu1 %v744_v33, %s1863_s25  ;;  %1714 = vmatprep.subr.msk.bf16.mxu1 %vm172_vm2, %v748_v34  ;;  %v742_v44 = vpack.c.bf16 %v740_v41, %v739_v42  ;;  %v1748_v41 = vld [vmem:[%s2288_s4 + $0x18] sm:$0xff]  }
 0xce8   :  { %1653 = vmatpush3.bf16.xpose.msra.mxu1 %v758_v35 }
 0xd59   :  { %v750_v38 = vpop.permute.xlu1 %749 }
 0xd5a   :  { %v761_v40 = vsel %vm172_vm2, %v750_v38, 0  ;;  %1715 = vmatprep.subr.msk.bf16.mxu1 %vm172_vm2, %v750_v38 }
 0xd5b   :  { %1655 = vmatpush3.bf16.xpose.msra.mxu1 %v761_v40  ;;  %v1747_v40 = vld [vmem:[%s2288_s4 + $0x10] sm:$0xff]  }
 0xd5c   :  { %1676 = vmatprep.subr.bf16.mxu1 %v1860_v15 }
 0xd62   :  { %1657 = vmatmul.mubr.msk.bf16.vlgmr.msra.gmra.mrb[12].mxu1 %vm172_vm2, %v742_v44 }
 0xd63   :  { %1680 = vmatprep.mubr.msk.bf16.mxu1 %vm1861_vm1, %v1860_v15 }
 0xe35   :  { %v1658_v45 = vpop.f32.mrb[12].mxu1 }
 0xe36   :  { %v806_v46 = vadd.f32 %v1658_v45, %v1998_v63  ;;  %v797_v49 = vpop.f32.mrb[13].mxu1 }
 0xe37   :  { %v798_v47 = vadd.f32 %v797_v49, %v1993_v61  ;;  %v1659_v50 = vpop.f32.mrb[14].mxu1 }
 0xe38   :  { %v800_v51 = vpop.f32.mrb[15].mxu1  ;;  %v818_v52 = vsel %vm40_vm0, %v806_v46, -inf  ;;  %v809_v54 = vadd.f32 %v1659_v50, %v2012_v8 }
 0xe39   :  { %v801_v55 = vadd.f32 %v800_v51, %v2003_v1  ;;  %819 = vmax.xlane.f32.xlu0 %v818_v52  ;;  %v812_v56 = vsel %vm40_vm0, %v798_v47, -inf }
 0xe3a   :  { %813 = vmax.xlane.f32.xlu1 %v812_v56  ;;  %v821_v63 = vsel %vm40_vm0, %v809_v54, -inf }
 0xe3b   :  { %v815_v53 = vsel %vm40_vm0, %v801_v55, -inf }
 0xe3d   :  { %816 = vmax.xlane.f32.xlu0 %v815_v53  ;;  %v938_v53 = vrot.slane %v2129_v19, %v1954_v30 }
 0xe41   :  { %822 = vmax.xlane.f32.xlu0 %v821_v63 }
 0xec6   :  { %v820_v57 = vpop.xlane.xlu0 %819 }
 0xec7   :  { %v826_v61 = vsub.f32 %v806_v46, %v820_v57  ;;  %v814_v58 = vpop.xlane.xlu1 %813 }
 0xec8   :  { %v824_v59 = vsub.f32 %v798_v47, %v814_v58 }
 0xec9   :  { %v832_v62 = vmul.f32 1.442695, %v826_v61 }
 0xeca   :  { %v828_v0 = vmul.f32 1.442695, %v824_v59  ;;  %v817_v2 = vpop.xlane.xlu0 %816 }
 0xecb   :  { %1791 = vpow2.f32 %v832_v62  ;;  %v825_v1 = vsub.f32 %v801_v55, %v817_v2 }
 0xecc   :  { %1793 = vpow2.f32 %v828_v0 }
 0xecd   :  { %v830_v7 = vmul.f32 1.442695, %v825_v1 }
 0xece   :  { %v823_v3 = vpop.xlane.xlu0 %822 }
 0xecf   :  { %v827_v5 = vsub.f32 %v809_v54, %v823_v3 }
 0xed1   :  { %v834_v9 = vmul.f32 1.442695, %v827_v5 }
 0xed3   :  { %1795 = vpow2.f32 %v834_v9 }
 0xed4   :  { %1797 = vpow2.f32 %v830_v7 }
 0xed5   :  { %v1792_v8 = vpop.eup %1791 }
 0xed6   :  { %v842_v10 = vsel %vm40_vm0, %v1792_v8, 0.0  ;;  %v1794_v11 = vpop.eup %1793 }
 0xed7   :  { %843 = vadd.xlane.f32.xlu1 %v842_v10  ;;  %v836_v12 = vsel %vm40_vm0, %v1794_v11, 0.0 }
 0xedb   :  { %837 = vadd.xlane.f32.xlu1 %v836_v12 }
 0xedd   :  { %v1796_v13 = vpop.eup %1795 }
 0xede   :  { %v845_v14 = vsel %vm40_vm0, %v1796_v13, 0.0  ;;  %v1798_v18 = vpop.eup %1797 }
 0xedf   :  { %846 = vadd.xlane.f32.xlu0 %v845_v14  ;;  %v839_v20 = vsel %vm40_vm0, %v1798_v18, 0.0 }
 0xee3   :  { %840 = vadd.xlane.f32.xlu0 %v839_v20 }
 0xeec   :  { %858 = vrot.lane.b32.xlu1 %v2135_v32, %s1864_s1 }
 0xef9   :  { %860 = vrot.lane.b32.xlu0 %v744_v33, %s1864_s1 }
 0xf64   :  { %v844_v21 = vpop.xlane.xlu1 %843 }
 0xf68   :  { %v838_v39 = vpop.xlane.xlu1 %837 }
 0xf6c   :  { %v847_v22 = vpop.xlane.xlu0 %846  ;;  %v859_v23 = vpop.permute.xlu1 %858 }
 0xf6d   :  { %1660 = vmatprep.subr.bf16.mxu0 %v859_v23  ;;  %1799 = vrcp.f32 %v847_v22 }
 0xf6e   :  { %1661 = vmatpush3.bf16.msra.mxu0 %v859_v23  ;;  %1801 = vrcp.f32 %v838_v39  ;;  %v1026_v23 = vrot.slane %v2129_v19, %v2062_v43 }
 0xf6f   :  { %1803 = vrcp.f32 %v844_v21 }
 0xf70   :  { %v841_v26 = vpop.xlane.xlu0 %840 }
 0xf71   :  { %1805 = vrcp.f32 %v841_v26 }
 0xf74   :  { %v861_v27 = vpop.permute.xlu0 %860 }
 0xf75   :  { %1662 = vmatprep.subr.bf16.mxu0 %v861_v27 }
 0xf76   :  { %1663 = vmatpush3.bf16.msra.mxu0 %v861_v27 }
 0xf77   :  { %1668 = vmatprep.subr.bf16.mxu0 %v1860_v15  ;;  %v1800_v28 = vpop.eup %1799 }
 0xf78   :  { %v1802_v29 = vpop.eup %1801  ;;  %v855_v25 = vmul.f32 %v1800_v28, %v1796_v13  ;;  %v1750_v13 = vld [vmem:[%s2289_s5 + $0x18] sm:$0xff]  }
 0xf79   :  { %v1804_v32 = vpop.eup %1803  ;;  %v852_v37 = vmul.f32 %v1802_v29, %v1794_v11 }
 0xf7a   :  { %v854_v34 = vmul.f32 %v1804_v32, %v1792_v8 }
 0xf7b   :  { %v1806_v36 = vpop.eup %1805 }
 0xf7c   :  { %v853_v33 = vmul.f32 %v1806_v36, %v1798_v18  ;;  %v857_v38 = vpack.c.bf16 %v855_v25, %v854_v34  ;;  %v1032_v36 = vrot.slane %v2129_v19, %v2067_v48 }
 0xf7e   :  { %v856_v35 = vpack.c.bf16 %v853_v33, %v852_v37 }
 0xf80   :  { %1664 = vmatprep.mubr.msk.bf16.mxu0 %vm40_vm0, %v856_v35  ;;  %v1751_v35 = vld [vmem:[%s2290_s6 + $0x20] sm:$0xff]  }
 0xf81   :  { %1665 = vmatmul.mubr.msk.bf16.vlgmr.msra.gmra.mrb[16].mxu0 %vm40_vm0, %v857_v38  ;;  %v1752_v38 = vld [vmem:[%s2290_s6 + $0x28] sm:$0xff]  }
 0xf82   :  { %1672 = vmatprep.mubr.msk.bf16.mxu0 %vm1861_vm1, %v1860_v15  ;;  %1669 = vmatpush3.bf16.msra.mxu0 %v1747_v40  ;;  %v1753_v40 = vld [vmem:[%s2290_s6 + $0x30] sm:$0xff]  }
 0xf83   :  { %1670 = vmatprep.subr.bf16.mxu0 %v1860_v15 }
 0xf86   :  { %1671 = vmatpush3.bf16.msra.mxu0 %v1748_v41  ;;  %v1754_v41 = vld [vmem:[%s2290_s6 + $0x38] sm:$0xff]  }
 0xf87   :  { %1684 = vmatprep.subr.bf16.mxu0 %v1860_v15 }
0x1054   :  { %v1666_v42 = vpop.f32.mrb[16].mxu0 }
0x1055   :  { %v904_v44 = vpop.f32.mrb[17].mxu0 }
0x1056   :  { %v1667_v45 = vpop.f32.mrb[18].mxu0 }
0x1057   :  { %v1730_v46 = vpack.i.bf16 %v1667_v45, %v1666_v42  ;;  %v907_v49 = vpop.f32.mrb[19].mxu0  ;;  %v1044_v42 = vrot.slane %v2129_v19, %v2090_v60 }
0x1059   :  { %1731 = vrot.lane.b32.xlu1 %v1730_v46, %s1865_s17 }
0x10cb   :  { %v1732_v47 = vpop.permute.xlu1 %1731 }
0x10cc   :  { %v1734_v50 = vunpack.i.h.bf16 %v1732_v47  ;;  %v1733_v51 = vunpack.i.l.bf16 %v1732_v47 }
0x10ce   :  { %v927_v52 = vsel %vm172_vm2, %v904_v44, %v1733_v51  ;;  %v928_v55 = vsel %vm172_vm2, %v907_v49, %v1734_v50 }
0x10cf   :  { %v929_v56 = vpack.c.bf16 %v928_v55, %v927_v52 }
0x10d1   :  { %1673 = vmatmul.mubr.msk.bf16.vlgmr.msra.gmra.mrb[20].mxu0 %vm40_vm0, %v929_v56 }
0x10d2   :  { %1692 = vmatprep.mubr.msk.bf16.mxu0 %vm1861_vm1, %v1860_v15  ;;  %1685 = vmatpush3.bf16.msra.mxu0 %v1751_v35 }
0x10d3   :  { %1686 = vmatprep.subr.bf16.mxu0 %v1860_v15 }
0x10d6   :  { %1687 = vmatpush3.bf16.msra.mxu0 %v1752_v38 }
0x10d7   :  { %1688 = vmatprep.subr.bf16.mxu0 %v1860_v15 }
0x10da   :  { %1689 = vmatpush3.bf16.msra.mxu0 %v1753_v40 }
0x10db   :  { %1690 = vmatprep.subr.bf16.mxu0 %v1860_v15 }
0x10de   :  { %1691 = vmatpush3.bf16.msra.mxu0 %v1754_v41 }
0x11a4   :  { %v988_v54 = vpop.f32.mrb[20].mxu0 }
0x11a5   :  { %v989_v63 = vadd.f32 %v988_v54, %v938_v53  ;;  %v1674_v57 = vpop.f32.mrb[21].mxu0 }
0x11a6   :  { %v991_v61 = vpop.f32.mrb[22].mxu0 }
0x11a7   :  { %v992_v58 = vadd.f32 %v991_v61, %v938_v53  ;;  %v1675_v59 = vpop.f32.mrb[23].mxu0  ;;  %v995_v62 = vadd.f32 %v989_v63, %v2119_v16 }
0x11a9   :  { %v997_v0 = vsel %vm40_vm0, %v995_v62, 0.0  ;;  %v996_v2 = vadd.f32 %v992_v58, %v2121_v17  ;;  %v1749_v17 = vld [vmem:[%s2289_s5 + $0x10] sm:$0xff]  }
0x11aa   :  { %998 = vadd.xlane.f32.xlu1 %v997_v0  ;;  %1677 = vmatpush3.bf16.msra.mxu1 %v1749_v17 }
0x11ab   :  { %v1000_v1 = vsel %vm40_vm0, %v996_v2, 0.0  ;;  %1678 = vmatprep.subr.bf16.mxu1 %v1860_v15 }
0x11ac   :  { %1001 = vadd.xlane.f32.xlu0 %v1000_v1 }
0x11ae   :  { %1679 = vmatpush3.bf16.msra.mxu1 %v1750_v13 }
0x11af   :  { %1696 = vmatprep.subr.bf16.mxu1 %v1860_v15 }
0x1237   :  { %v999_v3 = vpop.xlane.xlu1 %998 }
0x1238   :  { %v1003_v5 = vmul.f32 0.03125, %v999_v3 }
0x1239   :  { %v1002_v7 = vpop.xlane.xlu0 %1001 }
0x123a   :  { %v1005_v30 = vsub.f32 %v995_v62, %v1003_v5  ;;  %v1004_v9 = vmul.f32 0.03125, %v1002_v7 }
0x123c   :  { %v1006_v8 = vsub.f32 %v996_v2, %v1004_v9  ;;  %v1007_v10 = vmul.f32 %v1005_v30, %v1005_v30  ;;  %v1132_v9 = vrot.slane %v2129_v19, %v2096_v31 }
0x123e   :  { %v1009_v11 = vsel %vm40_vm0, %v1007_v10, 0.0  ;;  %v1008_v12 = vmul.f32 %v1006_v8, %v1006_v8 }
0x123f   :  { %1010 = vadd.xlane.f32.xlu0 %v1009_v11 }
0x1240   :  { %v1012_v16 = vsel %vm40_vm0, %v1008_v12, 0.0 }
0x1241   :  { %1013 = vadd.xlane.f32.xlu1 %v1012_v16 }
0x12cc   :  { %v1011_v14 = vpop.xlane.xlu0 %1010 }
0x12cd   :  { %v1015_v18 = vmul.f32 0.03125, %v1011_v14 }
0x12ce   :  { %v1014_v20 = vpop.xlane.xlu1 %1013 }
0x12cf   :  { %v1017_v21 = vadd.f32 1e-12, %v1015_v18  ;;  %v1016_v39 = vmul.f32 0.03125, %v1014_v20 }
0x12d1   :  { %1807 = vrsqrt.f32 %v1017_v21  ;;  %v1018_v22 = vadd.f32 1e-12, %v1016_v39 }
0x12d3   :  { %1809 = vrsqrt.f32 %v1018_v22 }
0x12db   :  { %v1808_v26 = vpop.eup %1807 }
0x12dc   :  { %v1021_v27 = vmul.f32 %v1808_v26, %v1005_v30 }
0x12dd   :  { %v1810_v28 = vpop.eup %1809 }
0x12de   :  { %v1027_v29 = vmul.f32 %v1026_v23, %v1021_v27  ;;  %v1022_v32 = vmul.f32 %v1810_v28, %v1006_v8 }
0x12e0   :  { %v1028_v25 = vmul.f32 %v1026_v23, %v1022_v32  ;;  %v1033_v37 = vadd.f32 %v1032_v36, %v1027_v29 }
0x12e2   :  { %v1034_v33 = vadd.f32 %v1032_v36, %v1028_v25  ;;  %v1755_v25 = vld [vmem:[%s2292_s8] sm:$0xff]  }
0x12e4   :  { %v1035_v34 = vpack.c.bf16 %v1034_v33, %v1033_v37 }
0x12e6   :  { %1681 = vmatmul.mubr.msk.bf16.vlgmr.msra.gmra.mrb[16].mxu1 %vm40_vm0, %v1035_v34 }
0x12e7   :  { %1700 = vmatprep.mubr.msk.bf16.mxu1 %vm1861_vm1, %v1860_v15  ;;  %1697 = vmatpush3.bf16.msra.mxu1 %v1755_v25 }
0x12e8   :  { %1698 = vmatprep.subr.bf16.mxu1 %v1860_v15 }
0x13b9   :  { %v1094_v44 = vpop.f32.mrb[16].mxu1 }
0x13ba   :  { %v1095_v45 = vadd.f32 %v1094_v44, %v1044_v42  ;;  %v1682_v46 = vpop.f32.mrb[17].mxu1 }
0x13bb   :  { %v1097_v49 = vpop.f32.mrb[18].mxu1 }
0x13bc   :  { %v1101_v47 = vmul.f32 %v1095_v45, %v1095_v45  ;;  %v1098_v50 = vadd.f32 %v1097_v49, %v1044_v42  ;;  %v1683_v51 = vpop.f32.mrb[19].mxu1  ;;  %v1232_v42 = vrot.slane %v2129_v19, %v651_v4  ;;  %v2250_v4 = vld [vmem:[%s2286_s2] sm:$0xff] }
0x13be   :  { %v1103_v52 = vmul.f32 %v1101_v47, %v1095_v45  ;;  %v1102_v55 = vmul.f32 %v1098_v50, %v1098_v50 }
0x13c0   :  { %v1105_v56 = vmul.f32 0.044715, %v1103_v52  ;;  %v1104_v53 = vmul.f32 %v1102_v55, %v1098_v50 }
0x13c2   :  { %v1107_v54 = vadd.f32 %v1105_v56, %v1095_v45  ;;  %v1106_v63 = vmul.f32 0.044715, %v1104_v53  ;;  %v1249_v53 = vrot.slane %v2250_v4, %v2062_v43 }
0x13c4   :  { %v1109_v57 = vmul.f32 0.7978846, %v1107_v54  ;;  %v1108_v61 = vadd.f32 %v1106_v63, %v1098_v50 }
0x13c6   :  { %1811 = vtanh.f32 %v1109_v57  ;;  %v1110_v58 = vmul.f32 0.7978846, %v1108_v61 }
0x13c8   :  { %1813 = vtanh.f32 %v1110_v58 }
0x13d0   :  { %v1812_v59 = vpop.eup %1811 }
0x13d1   :  { %v1113_v62 = vadd.f32 1.0, %v1812_v59 }
0x13d2   :  { %v1814_v0 = vpop.eup %1813 }
0x13d3   :  { %v1115_v2 = vmul.f32 0.5, %v1113_v62  ;;  %v1114_v1 = vadd.f32 1.0, %v1814_v0 }
0x13d5   :  { %v1116_v3 = vmul.f32 0.5, %v1114_v1  ;;  %v1117_v5 = vmul.f32 %v1115_v2, %v1095_v45 }
0x13d7   :  { %v1118_v7 = vmul.f32 %v1116_v3, %v1098_v50  ;;  %v1238_v50 = vrot.slane %v2129_v19, %v657_v6 }
0x13d9   :  { %v1119_v30 = vpack.c.bf16 %v1118_v7, %v1117_v5 }
0x13db   :  { %1693 = vmatmul.mubr.msk.bf16.vlgmr.msra.gmra.mrb[24].mxu0 %vm576_vm3, %v1119_v30 }
0x14ae   :  { %v1194_v8 = vpop.f32.mrb[24].mxu0 }
0x14af   :  { %v1195_v10 = vadd.f32 %v1194_v8, %v1132_v9  ;;  %v1694_v11 = vpop.f32.mrb[25].mxu0 }
0x14b0   :  { %v1197_v12 = vpop.f32.mrb[26].mxu0 }
0x14b1   :  { %v1198_v16 = vadd.f32 %v1197_v12, %v1132_v9  ;;  %v1695_v17 = vpop.f32.mrb[27].mxu0  ;;  %v1201_v13 = vadd.f32 %v1195_v10, %v1033_v37  ;;  %v1756_v37 = vld [vmem:[%s2292_s8 + $0x8] sm:$0xff]  }
0x14b2   :  { %1699 = vmatpush3.bf16.msra.mxu1 %v1756_v37 }
0x14b3   :  { %v1203_v14 = vsel %vm40_vm0, %v1201_v13, 0.0  ;;  %v1202_v18 = vadd.f32 %v1198_v16, %v1034_v33  ;;  %1704 = vmatprep.subr.bf16.mxu1 %v1860_v15 }
0x14b4   :  { %1204 = vadd.xlane.f32.xlu0 %v1203_v14 }
0x14b5   :  { %v1206_v20 = vsel %vm40_vm0, %v1202_v18, 0.0 }
0x14b6   :  { %1207 = vadd.xlane.f32.xlu1 %v1206_v20 }
0x1541   :  { %v1205_v21 = vpop.xlane.xlu0 %1204 }
0x1542   :  { %v1209_v39 = vmul.f32 0.03125, %v1205_v21 }
0x1543   :  { %v1208_v22 = vpop.xlane.xlu1 %1207 }
0x1544   :  { %v1211_v23 = vsub.f32 %v1201_v13, %v1209_v39  ;;  %v1210_v26 = vmul.f32 0.03125, %v1208_v22 }
0x1546   :  { %v1212_v27 = vsub.f32 %v1202_v18, %v1210_v26  ;;  %v1213_v28 = vmul.f32 %v1211_v23, %v1211_v23 }
0x1548   :  { %v1215_v29 = vsel %vm40_vm0, %v1213_v28, 0.0  ;;  %v1214_v32 = vmul.f32 %v1212_v27, %v1212_v27 }
0x1549   :  { %1216 = vadd.xlane.f32.xlu0 %v1215_v29  ;;  %v1757_v29 = vld [vmem:[%s2293_s9] sm:$0xff]  }
0x154a   :  { %v1218_v36 = vsel %vm40_vm0, %v1214_v32, 0.0  ;;  %v1758_v32 = vld [vmem:[%s2293_s9 + $0x8] sm:$0xff]   ;;  %s1866_s9 = smov [#allocation2]  }
0x154b   :  { %1219 = vadd.xlane.f32.xlu1 %v1218_v36  ;;  %s1468_s15 = sshll.u32 %s1866_s9, 4  ;;  %s1469_s15 = int_to_ptr.vmem [resolvable:$true] %s1468_s15 }
0x154c   :  { %s1836_s3 = scalar_lea.vmem %s1469_s15, 256  ;;  %p1841_p1 = scmp.lt.s32.totalorder %s1469_s15, %s1469_s15 }
0x154d   :  { %p1837_p0 = scmp.ne.s32.totalorder %s1469_s15, %s1836_s3  ;;  %p1842_p2 = scmp.lt.s32.totalorder %s1836_s3, %s1836_s3 }
0x154f   :  { %p1843_p3 = por %p1842_p2, %p1841_p1 }
0x1551   :  { %p1844_p4 = pnand %p1843_p3, %p1837_p0 }
0x15d6   :  { %v1217_v33 = vpop.xlane.xlu0 %1216 }
0x15d7   :  { %v1221_v34 = vmul.f32 0.03125, %v1217_v33 }
0x15d8   :  { %v1220_v35 = vpop.xlane.xlu1 %1219 }
0x15d9   :  { %v1223_v38 = vadd.f32 1e-12, %v1221_v34  ;;  %v1222_v40 = vmul.f32 0.03125, %v1220_v35 }
0x15db   :  { %1815 = vrsqrt.f32 %v1223_v38  ;;  %v1224_v41 = vadd.f32 1e-12, %v1222_v40  ;;  %v1353_v38 = vrot.slane %v2250_v4, %v2067_v48 }
0x15dd   :  { %1817 = vrsqrt.f32 %v1224_v41 }
0x15e5   :  { %v1816_v44 = vpop.eup %1815 }
0x15e6   :  { %v1227_v45 = vmul.f32 %v1816_v44, %v1211_v23  ;;  %v1359_v44 = vrot.slane %v2250_v4, %v2090_v60 }
0x15e7   :  { %v1818_v46 = vpop.eup %1817 }
0x15e8   :  { %v1233_v49 = vmul.f32 %v1232_v42, %v1227_v45  ;;  %v1228_v47 = vmul.f32 %v1818_v46, %v1212_v27 }
0x15ea   :  { %v1234_v51 = vmul.f32 %v1232_v42, %v1228_v47  ;;  %v1239_v52 = vadd.f32 %v1238_v50, %v1233_v49 }
0x15ec   :  { %v1240_v55 = vadd.f32 %v1238_v50, %v1234_v51  ;;  %v1370_v51 = vrot.slane %v2250_v4, %v2096_v31 }
0x15ee   :  { %v1241_v56 = vpack.c.bf16 %v1240_v55, %v1239_v52 }
0x15f0   :  { %1701 = vmatmul.mubr.msk.bf16.vlgmr.msra.gmra.mrb[20].mxu1 %vm40_vm0, %v1241_v56 }
0x15f1   :  { %1708 = vmatprep.mubr.msk.bf16.mxu1 %vm1861_vm1, %v1860_v15  ;;  %1705 = vmatpush3.bf16.msra.mxu1 %v1757_v29 }
0x15f2   :  { %1706 = vmatprep.subr.bf16.mxu1 %v1860_v15 }
0x15f5   :  { %1707 = vmatpush3.bf16.msra.mxu1 %v1758_v32 }
0x16c3   :  { %v1299_v24 = vpop.f32.mrb[20].mxu1 }
0x16c4   :  { %v1300_v54 = vadd.f32 %v1299_v24, %v1249_v53  ;;  %v1702_v6 = vpop.f32.mrb[21].mxu1 }
0x16c5   :  { %v1302_v19 = vpop.f32.mrb[22].mxu1 }
0x16c6   :  { %v1306_v63 = vmul.f32 %v1300_v54, %v1300_v54  ;;  %v1303_v57 = vadd.f32 %v1302_v19, %v1249_v53  ;;  %v1703_v61 = vpop.f32.mrb[23].mxu1 }
0x16c8   :  { %v1308_v58 = vmul.f32 %v1306_v63, %v1300_v54  ;;  %v1307_v59 = vmul.f32 %v1303_v57, %v1303_v57 }
0x16ca   :  { %v1310_v62 = vmul.f32 0.044715, %v1308_v58  ;;  %v1309_v0 = vmul.f32 %v1307_v59, %v1303_v57 }
0x16cc   :  { %v1312_v2 = vadd.f32 %v1310_v62, %v1300_v54  ;;  %v1311_v1 = vmul.f32 0.044715, %v1309_v0 }
0x16ce   :  { %v1313_v3 = vadd.f32 %v1311_v1, %v1303_v57  ;;  %v1314_v5 = vmul.f32 0.7978846, %v1312_v2 }
0x16d0   :  { %1819 = vtanh.f32 %v1314_v5  ;;  %v1315_v7 = vmul.f32 0.7978846, %v1313_v3 }
0x16d2   :  { %1821 = vtanh.f32 %v1315_v7 }
0x16da   :  { %v1820_v30 = vpop.eup %1819 }
0x16db   :  { %v1318_v43 = vadd.f32 1.0, %v1820_v30 }
0x16dc   :  { %v1822_v9 = vpop.eup %1821 }
0x16dd   :  { %v1320_v8 = vmul.f32 0.5, %v1318_v43  ;;  %v1319_v10 = vadd.f32 1.0, %v1822_v9 }
0x16df   :  { %v1322_v11 = vmul.f32 %v1320_v8, %v1300_v54  ;;  %v1321_v12 = vmul.f32 0.5, %v1319_v10 }
0x16e1   :  { %v1324_v16 = vsel %vm40_vm0, %v1322_v11, 0.0  ;;  %v1323_v17 = vmul.f32 %v1321_v12, %v1303_v57 }
0x16e2   :  { %1325 = vadd.xlane.f32.xlu0 %v1324_v16 }
0x16e3   :  { %v1327_v13 = vsel %vm40_vm0, %v1323_v17, 0.0 }
0x16e4   :  { %1328 = vadd.xlane.f32.xlu1 %v1327_v13 }
0x176f   :  { %v1326_v14 = vpop.xlane.xlu0 %1325 }
0x1770   :  { %v1330_v18 = vmul.f32 0.03125, %v1326_v14 }
0x1771   :  { %v1329_v20 = vpop.xlane.xlu1 %1328 }
0x1772   :  { %v1332_v21 = vsub.f32 %v1322_v11, %v1330_v18  ;;  %v1331_v39 = vmul.f32 0.03125, %v1329_v20 }
0x1774   :  { %v1333_v22 = vsub.f32 %v1323_v17, %v1331_v39  ;;  %v1334_v23 = vmul.f32 %v1332_v21, %v1332_v21 }
0x1776   :  { %v1336_v26 = vsel %vm40_vm0, %v1334_v23, 0.0  ;;  %v1335_v27 = vmul.f32 %v1333_v22, %v1333_v22 }
0x1777   :  { %1337 = vadd.xlane.f32.xlu0 %v1336_v26 }
0x1778   :  { %v1339_v28 = vsel %vm40_vm0, %v1335_v27, 0.0 }
0x1779   :  { %1340 = vadd.xlane.f32.xlu1 %v1339_v28 }
0x1804   :  { %v1338_v36 = vpop.xlane.xlu0 %1337 }
0x1805   :  { %v1342_v25 = vmul.f32 0.03125, %v1338_v36 }
0x1806   :  { %v1341_v37 = vpop.xlane.xlu1 %1340 }
0x1807   :  { %v1344_v33 = vadd.f32 1e-12, %v1342_v25  ;;  %v1343_v34 = vmul.f32 0.03125, %v1341_v37 }
0x1809   :  { %1823 = vrsqrt.f32 %v1344_v33  ;;  %v1345_v35 = vadd.f32 1e-12, %v1343_v34 }
0x180b   :  { %1825 = vrsqrt.f32 %v1345_v35 }
0x1813   :  { %v1824_v40 = vpop.eup %1823 }
0x1814   :  { %v1348_v41 = vmul.f32 %v1824_v40, %v1332_v21 }
0x1815   :  { %v1826_v42 = vpop.eup %1825 }
0x1816   :  { %v1354_v45 = vmul.f32 %v1353_v38, %v1348_v41  ;;  %v1349_v15 = vmul.f32 %v1826_v42, %v1333_v22 }
0x1818   :  { %v1355_v46 = vmul.f32 %v1353_v38, %v1349_v15  ;;  %v1360_v49 = vadd.f32 %v1359_v44, %v1354_v45 }
0x181a   :  { %v1361_v47 = vadd.f32 %v1359_v44, %v1355_v46 }
0x181c   :  { %v1362_v50 = vpack.c.bf16 %v1361_v47, %v1360_v49 }
0x181e   :  { %1709 = vmatmul.mubr.msk.bf16.vlgmr.msra.gmra.mrb[24].mxu1 %vm40_vm0, %v1362_v50 }
0x18f1   :  { %v1420_v52 = vpop.f32.mrb[24].mxu1 }
0x18f2   :  { %v1421_v55 = vadd.f32 %v1420_v52, %v1370_v51  ;;  %v1710_v48 = vpop.f32.mrb[25].mxu1 }
0x18f3   :  { %v1423_v56 = vpop.f32.mrb[26].mxu1 }
0x18f4   :  { %v1427_v53 = vrot.slane %v1421_v55, 4  ;;  %v1424_v24 = vadd.f32 %v1423_v56, %v1370_v51  ;;  %v1711_v54 = vpop.f32.mrb[27].mxu1 }
0x18f6   :  { %v1428_v6 = vmax.f32 %v1421_v55, %v1427_v53  ;;  %v1433_v60 = vrot.slane %v1424_v24, 4 }
0x18f8   :  { %v1429_v19 = vrot.slane %v1428_v6, 2  ;;  %v1434_v63 = vmax.f32 %v1424_v24, %v1433_v60 }
0x18fa   :  { %v1430_v57 = vmax.f32 %v1428_v6, %v1429_v19  ;;  %v1435_v61 = vrot.slane %v1434_v63, 2 }
0x18fc   :  { %v1431_v58 = vrot.slane %v1430_v57, 1  ;;  %v1436_v59 = vmax.f32 %v1434_v63, %v1435_v61 }
0x18fe   :  { %v1432_v62 = vmax.f32 %v1430_v57, %v1431_v58  ;;  %v1437_v0 = vrot.slane %v1436_v59, 1 }
0x1900   :  { %v1439_v2 = vsub.f32 %v1421_v55, %v1432_v62  ;;  %v1438_v1 = vmax.f32 %v1436_v59, %v1437_v0 }
0x1902   :  { %v1441_v31 = vmul.f32 1.442695, %v1439_v2  ;;  %v1440_v4 = vsub.f32 %v1424_v24, %v1438_v1 }
0x1904   :  { %1827 = vpow2.f32 %v1441_v31  ;;  %v1443_v3 = vmul.f32 1.442695, %v1440_v4 }
0x1906   :  { %1829 = vpow2.f32 %v1443_v3 }
0x190e   :  { %v1828_v5 = vpop.eup %1827 }
0x190f   :  { %v1445_v7 = vrot.slane %v1828_v5, 4 }
0x1910   :  { %v1830_v30 = vpop.eup %1829 }
0x1911   :  { %v1446_v43 = vadd.f32 %v1828_v5, %v1445_v7  ;;  %v1451_v9 = vrot.slane %v1830_v30, 4 }
0x1913   :  { %v1447_v8 = vrot.slane %v1446_v43, 2  ;;  %v1452_v10 = vadd.f32 %v1830_v30, %v1451_v9 }
0x1915   :  { %v1448_v11 = vadd.f32 %v1447_v8, %v1446_v43  ;;  %v1453_v12 = vrot.slane %v1452_v10, 2 }
0x1917   :  { %v1449_v16 = vrot.slane %v1448_v11, 1  ;;  %v1454_v17 = vadd.f32 %v1453_v12, %v1452_v10 }
0x1919   :  { %v1450_v13 = vadd.f32 %v1449_v16, %v1448_v11  ;;  %v1455_v14 = vrot.slane %v1454_v17, 1 }
0x191b   :  { %v1456_v18 = vadd.f32 %v1455_v14, %v1454_v17  ;;  %1831 = vrcp.f32 %v1450_v13 }
0x191d   :  { %1833 = vrcp.f32 %v1456_v18 }
0x1925   :  { %v1832_v20 = vpop.eup %1831 }
0x1926   :  { %v1458_v21 = vmul.f32 %v1832_v20, %v1828_v5 }
0x1927   :  { %v1834_v39 = vpop.eup %1833 }
0x1928   :  { %v1460_v22 = vmul.f32 %v1834_v39, %v1830_v30  ;;  %1461 = vst [vmem:[#allocation2] sm:$0xff] %v1458_v21 }
0x192a   :  { %1462 = vst [vmem:[#allocation2 + $0x8] sm:$0xff] %v1460_v22 }
0x192b   :  { %1847 = shalt.err (!%p1844_p4)
}
0x192c   :  { %s1848_s24 = scalar_lea.hbm %s2294_s10, 256 }
0x192d   :  { %p1849_p5 = scmp.ne.s32.totalorder %s2294_s10, %s1848_s24  ;;  %p1852_p6 = scmp.lt.u32.totalorder %s1848_s24, %s2294_s10 }
0x192f   :  { %p1854_p7 = pnand %p1852_p6, %p1849_p5 }
0x1931   :  { %1857 = shalt.err (!%p1854_p7)
}
0x1932   :  { %s1867_s17 = smov 128   ;;  %s1868_s18 = smov 8  }
0x1933   :  { %1474 = dma.vmem_to_hbm [thread:$0]  %s1469_s15, 256, %s2294_s10, [#allocation3], %s1867_s17, %s1867_s17, %s1868_s18  }
0x1934   :  { %1858 = dma.done.wait [#allocation3], 256  }
0x1935   :  { %1859 = vsyncadd [#allocation3], 4294967040 }
0x1936   :  { %1478 = vsyncpa [#allocation3], 1 }

</bundles_post_ra>
